<compile_context>
chip_gen: v7x
topology: tpu7x:2x2x1
jax: 0.10.0
libtpu: 0.0.40
codegen_flags: <defaults>
</compile_context>

<pallas_src>
import jax
import jax.numpy as jnp
from jax.experimental import pallas as pl
from jax.experimental.pallas import tpu as pltpu

_LANE = 128
_SUBLANE = 8


# ---------------------------------------------------------------------------
# helpers
# ---------------------------------------------------------------------------
def _round_up(v: int, m: int) -> int:
    return -(-v // m) * m


def _batch_plan(n: int, cap: int = 1024, min_tiles: int = 4):
    """Pick (tile, n_pad): tile is a multiple of 8 and <= cap; n_pad = nt*tile.

    Targets >= `min_tiles` grid steps (so the parallel batch axis can shard
    across v7x's two TensorCores) while preferring the largest tile allowed.
    Non-divisible N is handled by padding (rows >= N are masked in-kernel
    for the loss partials and sliced off for the activations).
    """
    cap = max(_SUBLANE, cap - cap % _SUBLANE)
    target = _round_up(max(_SUBLANE, -(-n // min_tiles)), _SUBLANE)
    tile = min(cap, target)
    n_pad = _round_up(n, tile)
    return tile, n_pad


def _vmem_limit_bytes() -> int:
    """Generation-aware scoped-VMEM limit (<=48 MiB on 64-MiB parts)."""
    try:
        cap = int(getattr(pltpu.get_tpu_info(), "vmem_capacity_bytes", 0))
    except Exception:  # pragma: no cover - query unavailable -> conservative
        cap = 0
    if cap >= 100 * 1024 * 1024:          # v5e / v6e (128 MiB physical)
        return 64 * 1024 * 1024
    return 48 * 1024 * 1024               # v7x-class (64 MiB physical) / unknown


def _compiler_params():
    return pltpu.CompilerParams(
        dimension_semantics=("parallel",),        # batch tiles are independent
        vmem_limit_bytes=_vmem_limit_bytes())


def _resident_spec(shape):
    # whole-array block that stays resident across the batch grid
    return pl.BlockSpec(shape, lambda i, _nd=len(shape): (0,) * _nd)


# ---------------------------------------------------------------------------
# Pallas kernels
# ---------------------------------------------------------------------------
def _make_train_kernel(tn: int, n_valid: int, n_pad: int):
    """Fused AL training forward for one batch tile.

    s  = f(x) = x @ Wf + bf        t  = g(y) = y @ Wg + bg
    s0 = b(s) = s @ Wb + bb        t0 = inv(t) = t @ Wi + bi
    pb = sum((s0 - t)^2)   (per-tile partial of loss_b, padded rows masked)
    pa = sum((t0 - y)^2)   (per-tile partial of loss_ae, vs. f32 y)
    """
    need_mask = n_pad != n_valid

    def kernel(x_ref, y_ref,
               wf_ref, bf_ref, wg_ref, bg_ref,
               wb_ref, bb_ref, wi_ref, bi_ref,
               s_ref, t_ref, pb_ref, pa_ref):
        x = x_ref[...]                               # (tn, Dx) f32
        y = y_ref[...]                               # (tn, Dy) f32
        # bf16 cast happens in-kernel (VPU has slack); MXU accumulates in f32.
        xb = x.astype(jnp.bfloat16)
        yb = y.astype(jnp.bfloat16)

        s = jnp.dot(xb, wf_ref[...],
                    preferred_element_type=jnp.float32) + bf_ref[...]
        t = jnp.dot(yb, wg_ref[...],
                    preferred_element_type=jnp.float32) + bg_ref[...]
        s0 = jnp.dot(s.astype(jnp.bfloat16), wb_ref[...],
                     preferred_element_type=jnp.float32) + bb_ref[...]
        t0 = jnp.dot(t.astype(jnp.bfloat16), wi_ref[...],
                     preferred_element_type=jnp.float32) + bi_ref[...]

        # .detach() has no effect in a forward-only kernel: values identical.
        s_ref[...] = s.astype(s_ref.dtype)           # bf16 writeback
        t_ref[...] = t.astype(t_ref.dtype)

        db = s0 - t
        da = t0 - y                                  # against ORIGINAL f32 y
        if need_mask:
            row = (pl.program_id(0) * tn
                   + jax.lax.broadcasted_iota(jnp.int32, (tn, 1), 0))
            valid = (row < n_valid).astype(jnp.float32)
            db = db * valid
            da = da * valid
        # lane-dense (1,1,128) block, every lane carries the tile's sum ->
        # unmasked store; the wrapper reads element [0,0] and sums over tiles.
        pb_ref[...] = jnp.full(pb_ref.shape, jnp.sum(db * db), jnp.float32)
        pa_ref[...] = jnp.full(pa_ref.shape, jnp.sum(da * da), jnp.float32)

    return kernel


def _linear_kernel(x_ref, w_ref, b_ref, o_ref):
    o_ref[...] = (jnp.dot(x_ref[...].astype(jnp.bfloat16), w_ref[...],
                          preferred_element_type=jnp.float32)
                  + b_ref[...]).astype(o_ref.dtype)


def _bridge_kernel(x_ref, wf_ref, bf_ref, wb_ref, bb_ref, wi_ref, bi_ref,
                   o_ref):
    s = jnp.dot(x_ref[...].astype(jnp.bfloat16), wf_ref[...],
                preferred_element_type=jnp.float32) + bf_ref[...]
    s0 = jnp.dot(s.astype(jnp.bfloat16), wb_ref[...],
                 preferred_element_type=jnp.float32) + bb_ref[...]
    t0 = jnp.dot(s0.astype(jnp.bfloat16), wi_ref[...],
                 preferred_element_type=jnp.float32) + bi_ref[...]
    o_ref[...] = t0.astype(o_ref.dtype)


# ---------------------------------------------------------------------------
# pallas_call wrappers
# ---------------------------------------------------------------------------
def _pallas_al_train(x, y, params, tile_cap=1024, act_dtype=jnp.bfloat16):
    N, Dx = x.shape
    Dy = y.shape[1]
    Ds = params["wf"].shape[1]
    Dt = params["wg"].shape[1]
    tn, n_pad = _batch_plan(N, tile_cap)
    nt = n_pad // tn

    xf = x.astype(jnp.float32)
    yf = y.astype(jnp.float32)
    if n_pad != N:
        xf = jnp.pad(xf, ((0, n_pad - N), (0, 0)))
        yf = jnp.pad(yf, ((0, n_pad - N), (0, 0)))

    def batch_spec(d):
        return pl.BlockSpec((tn, d), lambda i: (i, 0))

    args = (xf, yf,
            params["wf"], params["bf"], params["wg"], params["bg"],
            params["wb"], params["bb"], params["wi"], params["bi"])
    in_specs = ([batch_spec(Dx), batch_spec(Dy)]
                + [_resident_spec(a.shape) for a in args[2:]])

    out_shape = (
        jax.ShapeDtypeStruct((n_pad, Ds), act_dtype),             # s
        jax.ShapeDtypeStruct((n_pad, Dt), act_dtype),             # t
        jax.ShapeDtypeStruct((nt, 1, _LANE), jnp.float32),        # loss_b partials
        jax.ShapeDtypeStruct((nt, 1, _LANE), jnp.float32),        # loss_ae partials
    )
    out_specs = [
        batch_spec(Ds),
        batch_spec(Dt),
        pl.BlockSpec((1, 1, _LANE), lambda i: (i, 0, 0)),
        pl.BlockSpec((1, 1, _LANE), lambda i: (i, 0, 0)),
    ]

    act_bytes = jnp.dtype(act_dtype).itemsize
    flops = 2 * n_pad * (Dx * Ds + Dy * Dt + Ds * Dt + Dt * Dy)
    bytes_accessed = (xf.size * 4 + yf.size * 4
                      + sum(params[k].size * params[k].dtype.itemsize
                            for k in params)
                      + n_pad * (Ds + Dt) * act_bytes
                      + 2 * nt * _LANE * 4)

    s, t, pb, pa = pl.pallas_call(
        _make_train_kernel(tn, N, n_pad),
        out_shape=out_shape,
        grid=(nt,),
        in_specs=in_specs,
        out_specs=out_specs,
        compiler_params=_compiler_params(),
        cost_estimate=pl.CostEstimate(flops=flops, transcendentals=0,
                                      bytes_accessed=bytes_accessed),
    )(*args)

    if n_pad != N:
        s, t = s[:N], t[:N]
    loss_b = jnp.sum(pb[:, 0, 0]) / (N * Dt)
    loss_ae = jnp.sum(pa[:, 0, 0]) / (N * Dy)
    return s, t, loss_b, loss_ae


def _pallas_linear(x, w, b, tile_cap=1024):
    """x: [N, Din] f32, w: [Din, Dout] bf16, b: [1, Dout] f32."""
    N, Din = x.shape
    Dout = w.shape[1]
    tn, n_pad = _batch_plan(N, tile_cap)
    xf = x.astype(jnp.float32)
    if n_pad != N:
        xf = jnp.pad(xf, ((0, n_pad - N), (0, 0)))
    flops = 2 * n_pad * Din * Dout
    bytes_accessed = xf.size * 4 + w.size * 2 + b.size * 4 + n_pad * Dout * 4
    out = pl.pallas_call(
        _linear_kernel,
        out_shape=jax.ShapeDtypeStruct((n_pad, Dout), jnp.float32),
        grid=(n_pad // tn,),
        in_specs=[pl.BlockSpec((tn, Din), lambda i: (i, 0)),
                  _resident_spec(w.shape),
                  _resident_spec(b.shape)],
        out_specs=pl.BlockSpec((tn, Dout), lambda i: (i, 0)),
        compiler_params=_compiler_params(),
        cost_estimate=pl.CostEstimate(flops=flops, transcendentals=0,
                                      bytes_accessed=bytes_accessed),
    )(xf, w, b)
    return out[:N] if n_pad != N else out


def _pallas_bridge(x, params, tile_cap=1024):
    """Fused f -> b -> inv (intermediates stay in VMEM/vregs)."""
    N, Dx = x.shape
    Dy = params["wi"].shape[1]
    Ds, Dt = params["wf"].shape[1], params["wb"].shape[1]
    tn, n_pad = _batch_plan(N, tile_cap)
    xf = x.astype(jnp.float32)
    if n_pad != N:
        xf = jnp.pad(xf, ((0, n_pad - N), (0, 0)))
    wargs = (params["wf"], params["bf"], params["wb"], params["bb"],
             params["wi"], params["bi"])
    flops = 2 * n_pad * (Dx * Ds + Ds * Dt + Dt * Dy)
    bytes_accessed = (xf.size * 4
                      + sum(a.size * a.dtype.itemsize for a in wargs)
                      + n_pad * Dy * 4)
    out = pl.pallas_call(
        _bridge_kernel,
        out_shape=jax.ShapeDtypeStruct((n_pad, Dy), jnp.float32),
        grid=(n_pad // tn,),
        in_specs=([pl.BlockSpec((tn, Dx), lambda i: (i, 0))]
                  + [_resident_spec(a.shape) for a in wargs]),
        out_specs=pl.BlockSpec((tn, Dy), lambda i: (i, 0)),
        compiler_params=_compiler_params(),
        cost_estimate=pl.CostEstimate(flops=flops, transcendentals=0,
                                      bytes_accessed=bytes_accessed),
    )(xf, *wargs)
    return out[:N] if n_pad != N else out


# ---------------------------------------------------------------------------
# ALComponent (JAX / Pallas version)
# ---------------------------------------------------------------------------
class ALComponent:
    """Pallas re-implementation of the PyTorch ALComponent base block."""

    def __init__(self, key, dx, ds, dt, dy):
        def _linear_init(k, din, dout):
            # deterministic, PyTorch-Linear-like U(-1/sqrt(din), 1/sqrt(din))
            k_w, k_b = jax.random.split(k)
            lim = 1.0 / (din ** 0.5)
            w = jax.random.uniform(k_w, (din, dout), jnp.float32, -lim, lim)
            b = jax.random.uniform(k_b, (1, dout), jnp.float32, -lim, lim)
            # weights live in bf16 (MXU-native, half the HBM bytes); biases f32.
            return w.astype(jnp.bfloat16), b

        kf, kg, kb, ki = jax.random.split(key, 4)
        wf, bf = _linear_init(kf, dx, ds)   # f
        wg, bg = _linear_init(kg, dy, dt)   # g
        wb, bb = _linear_init(kb, ds, dt)   # b (bridge)
        wi, bi = _linear_init(ki, dt, dy)   # inv
        self.params = dict(wf=wf, bf=bf, wg=wg, bg=bg,
                           wb=wb, bb=bb, wi=wi, bi=bi)
        self.training = True

    # -- torch forward() semantics --------------------------------------
    def forward(self, x=None, y=None, label=None):
        if self.training:
            s, t, loss_b, loss_ae = _pallas_al_train(x, y, self.params)
            loss_f = 0.0
            # s.detach()/t.detach(): no autodiff here, values are identical.
            return s, t, loss_f, loss_b, loss_ae
        elif y is None:
            return _pallas_linear(x, self.params["wf"], self.params["bf"])
        else:
            return _pallas_linear(y, self.params["wi"], self.params["bi"])

    def bridge_forward(self, x):
        return _pallas_bridge(x, self.params)


# ---------------------------------------------------------------------------
# Pure-JAX reference (same bf16 matmul inputs, f32 accumulation, f32-y loss)
# ---------------------------------------------------------------------------
def _reference_train(x, y, p):
    xb = x.astype(jnp.bfloat16)
    yb = y.astype(jnp.bfloat16)
    s = jnp.dot(xb, p["wf"], preferred_element_type=jnp.float32) + p["bf"]
    t = jnp.dot(yb, p["wg"], preferred_element_type=jnp.float32) + p["bg"]
    s0 = jnp.dot(s.astype(jnp.bfloat16), p["wb"],
                 preferred_element_type=jnp.float32) + p["bb"]
    t0 = jnp.dot(t.astype(jnp.bfloat16), p["wi"],
                 preferred_element_type=jnp.float32) + p["bi"]
    return (s, t,
            jnp.mean((s0 - t) ** 2),
            jnp.mean((t0 - y.astype(jnp.float32)) ** 2))


def _reference_bridge(x, p):
    xb = x.astype(jnp.bfloat16)
    s = jnp.dot(xb, p["wf"], preferred_element_type=jnp.float32) + p["bf"]
    s0 = jnp.dot(s.astype(jnp.bfloat16), p["wb"],
                 preferred_element_type=jnp.float32) + p["bb"]
    return jnp.dot(s0.astype(jnp.bfloat16), p["wi"],
                   preferred_element_type=jnp.float32) + p["bi"]


if __name__ == "__main__":
    key = jax.random.PRNGKey(0)
    k_params, k_x, k_y, k_x2, k_y2 = jax.random.split(key, 5)

    # lane-dense feature dims (multiples of 128) and a multi-tile batch.
    N, Dx, Ds, Dt, Dy = 512, 128, 128, 128, 128
    block = ALComponent(k_params, Dx, Ds, Dt, Dy)

    x = jax.random.normal(k_x, (N, Dx), jnp.float32)
    y = jax.random.normal(k_y, (N, Dy), jnp.float32)

    # training-mode forward (fused Pallas kernel)
    s, t, loss_f, loss_b, loss_ae = block.forward(x, y)
    jax.block_until_ready((s, t, loss_b, loss_ae))

    # eval-mode paths + fused bridge_forward
    block.training = False
    s_eval = block.forward(x)
    t0_eval = block.forward(x, y)
    t0_bridge = block.bridge_forward(x)
    jax.block_until_ready((s_eval, t0_eval, t0_bridge))

    # correctness vs. pure-JAX reference
    s_r, t_r, lb_r, la_r = _reference_train(x, y, block.params)
    tb_r = _reference_bridge(x, block.params)
    t0_eval_r = (jnp.dot(y.astype(jnp.bfloat16), block.params["wi"],
                         preferred_element_type=jnp.float32)
                 + block.params["bi"])

    def close(a, b, tol=5e-3):
        return bool(jnp.allclose(jnp.asarray(a, jnp.float32),
                                 jnp.asarray(b, jnp.float32),
                                 atol=tol, rtol=tol))

    # s/t are stored as bf16 -> compare with bf16-level tolerance
    assert close(s, s_r, tol=2e-2)
    assert close(t, t_r, tol=2e-2)
    assert close(loss_b, lb_r)
    assert close(loss_ae, la_r)
    assert close(s_eval, s_r)
    assert close(t0_eval, t0_eval_r)
    assert close(t0_bridge, tb_r)

    # ragged-batch path (N not a multiple of the tile): exercises padding +
    # in-kernel row masking of the loss partials.
    block.training = True
    N2 = 300
    x2 = jax.random.normal(k_x2, (N2, Dx), jnp.float32)
    y2 = jax.random.normal(k_y2, (N2, Dy), jnp.float32)
    s2, t2, _, lb2, la2 = block.forward(x2, y2)
    jax.block_until_ready((s2, t2, lb2, la2))
    s2_r, t2_r, lb2_r, la2_r = _reference_train(x2, y2, block.params)
    assert s2.shape == (N2, Ds) and t2.shape == (N2, Dt)
    assert close(s2, s2_r, tol=2e-2)
    assert close(t2, t2_r, tol=2e-2)
    assert close(lb2, lb2_r)
    assert close(la2, la2_r)

    print("KERNEL_OK")
</pallas_src>

<mosaic_0001>
module attributes {stable_mosaic.version = 11 : i64} {
  func.func @kernel(%arg0: i32, %arg1: memref<128x128xf32, #tpu.memory_space<vmem>>, %arg2: memref<128x128xf32, #tpu.memory_space<vmem>>, %arg3: memref<128x128xbf16, #tpu.memory_space<vmem>>, %arg4: memref<1x128xf32, #tpu.memory_space<vmem>>, %arg5: memref<128x128xbf16, #tpu.memory_space<vmem>>, %arg6: memref<1x128xf32, #tpu.memory_space<vmem>>, %arg7: memref<128x128xbf16, #tpu.memory_space<vmem>>, %arg8: memref<1x128xf32, #tpu.memory_space<vmem>>, %arg9: memref<128x128xbf16, #tpu.memory_space<vmem>>, %arg10: memref<1x128xf32, #tpu.memory_space<vmem>>, %arg11: memref<128x128xbf16, #tpu.memory_space<vmem>>, %arg12: memref<128x128xbf16, #tpu.memory_space<vmem>>, %arg13: memref<1x1x128xf32, #tpu.memory_space<vmem>>, %arg14: memref<1x1x128xf32, #tpu.memory_space<vmem>>) attributes {dimension_semantics = [#tpu.dimension_semantics<parallel>], iteration_bounds = array<i64: 4>, scalar_prefetch = 0 : i64, scratch_operands = 0 : i64, tpu.core_type = #tpu.core_type<tc>, window_params = [{transform_indices = @transform_0, window_bounds = array<i64: 128, 128>}, {transform_indices = @transform_1, window_bounds = array<i64: 128, 128>}, {pipeline_mode = #tpu.pipeline_mode<synchronous>, transform_indices = @transform_2, window_bounds = array<i64: 128, 128>}, {pipeline_mode = #tpu.pipeline_mode<synchronous>, transform_indices = @transform_3, window_bounds = array<i64: 1, 128>}, {pipeline_mode = #tpu.pipeline_mode<synchronous>, transform_indices = @transform_4, window_bounds = array<i64: 128, 128>}, {pipeline_mode = #tpu.pipeline_mode<synchronous>, transform_indices = @transform_5, window_bounds = array<i64: 1, 128>}, {pipeline_mode = #tpu.pipeline_mode<synchronous>, transform_indices = @transform_6, window_bounds = array<i64: 128, 128>}, {pipeline_mode = #tpu.pipeline_mode<synchronous>, transform_indices = @transform_7, window_bounds = array<i64: 1, 128>}, {pipeline_mode = #tpu.pipeline_mode<synchronous>, transform_indices = @transform_8, window_bounds = array<i64: 128, 128>}, {pipeline_mode = #tpu.pipeline_mode<synchronous>, transform_indices = @transform_9, window_bounds = array<i64: 1, 128>}, {transform_indices = @transform_10, window_bounds = array<i64: 128, 128>}, {transform_indices = @transform_11, window_bounds = array<i64: 128, 128>}, {transform_indices = @transform_12, window_bounds = array<i64: 1, 1, 128>}, {transform_indices = @transform_13, window_bounds = array<i64: 1, 1, 128>}]} {
    %c0 = arith.constant 0 : index
    %c0_0 = arith.constant 0 : index
    %0 = vector.load %arg1[%c0, %c0_0] : memref<128x128xf32, #tpu.memory_space<vmem>>, vector<128x128xf32>
    %c0_1 = arith.constant 0 : index
    %c0_2 = arith.constant 0 : index
    %1 = vector.load %arg2[%c0_1, %c0_2] : memref<128x128xf32, #tpu.memory_space<vmem>>, vector<128x128xf32>
    %2 = arith.truncf %0 : vector<128x128xf32> to vector<128x128xbf16>
    %3 = arith.truncf %1 : vector<128x128xf32> to vector<128x128xbf16>
    %c0_3 = arith.constant 0 : index
    %c0_4 = arith.constant 0 : index
    %4 = vector.load %arg3[%c0_3, %c0_4] : memref<128x128xbf16, #tpu.memory_space<vmem>>, vector<128x128xbf16>
    %cst = arith.constant dense<0.000000e+00> : vector<128x128xf32>
    %5 = tpu.matmul %2, %4, %cst {dimension_numbers = #tpu.dot_dimension_numbers<[1], [0], [0], [1], [0, 0, 1, 1], [], []>} : vector<128x128xbf16>, vector<128x128xbf16>, vector<128x128xf32> -> vector<128x128xf32>
    %c0_5 = arith.constant 0 : index
    %c0_6 = arith.constant 0 : index
    %6 = vector.load %arg4[%c0_5, %c0_6] : memref<1x128xf32, #tpu.memory_space<vmem>>, vector<1x128xf32>
    %7 = vector.broadcast %6 : vector<1x128xf32> to vector<128x128xf32>
    %8 = arith.addf %5, %7 : vector<128x128xf32>
    %c0_7 = arith.constant 0 : index
    %c0_8 = arith.constant 0 : index
    %9 = vector.load %arg5[%c0_7, %c0_8] : memref<128x128xbf16, #tpu.memory_space<vmem>>, vector<128x128xbf16>
    %cst_9 = arith.constant dense<0.000000e+00> : vector<128x128xf32>
    %10 = tpu.matmul %3, %9, %cst_9 {dimension_numbers = #tpu.dot_dimension_numbers<[1], [0], [0], [1], [0, 0, 1, 1], [], []>} : vector<128x128xbf16>, vector<128x128xbf16>, vector<128x128xf32> -> vector<128x128xf32>
    %c0_10 = arith.constant 0 : index
    %c0_11 = arith.constant 0 : index
    %11 = vector.load %arg6[%c0_10, %c0_11] : memref<1x128xf32, #tpu.memory_space<vmem>>, vector<1x128xf32>
    %12 = vector.broadcast %11 : vector<1x128xf32> to vector<128x128xf32>
    %13 = arith.addf %10, %12 : vector<128x128xf32>
    %14 = arith.truncf %8 : vector<128x128xf32> to vector<128x128xbf16>
    %c0_12 = arith.constant 0 : index
    %c0_13 = arith.constant 0 : index
    %15 = vector.load %arg7[%c0_12, %c0_13] : memref<128x128xbf16, #tpu.memory_space<vmem>>, vector<128x128xbf16>
    %cst_14 = arith.constant dense<0.000000e+00> : vector<128x128xf32>
    %16 = tpu.matmul %14, %15, %cst_14 {dimension_numbers = #tpu.dot_dimension_numbers<[1], [0], [0], [1], [0, 0, 1, 1], [], []>} : vector<128x128xbf16>, vector<128x128xbf16>, vector<128x128xf32> -> vector<128x128xf32>
    %c0_15 = arith.constant 0 : index
    %c0_16 = arith.constant 0 : index
    %17 = vector.load %arg8[%c0_15, %c0_16] : memref<1x128xf32, #tpu.memory_space<vmem>>, vector<1x128xf32>
    %18 = vector.broadcast %17 : vector<1x128xf32> to vector<128x128xf32>
    %19 = arith.addf %16, %18 : vector<128x128xf32>
    %20 = arith.truncf %13 : vector<128x128xf32> to vector<128x128xbf16>
    %c0_17 = arith.constant 0 : index
    %c0_18 = arith.constant 0 : index
    %21 = vector.load %arg9[%c0_17, %c0_18] : memref<128x128xbf16, #tpu.memory_space<vmem>>, vector<128x128xbf16>
    %cst_19 = arith.constant dense<0.000000e+00> : vector<128x128xf32>
    %22 = tpu.matmul %20, %21, %cst_19 {dimension_numbers = #tpu.dot_dimension_numbers<[1], [0], [0], [1], [0, 0, 1, 1], [], []>} : vector<128x128xbf16>, vector<128x128xbf16>, vector<128x128xf32> -> vector<128x128xf32>
    %c0_20 = arith.constant 0 : index
    %c0_21 = arith.constant 0 : index
    %23 = vector.load %arg10[%c0_20, %c0_21] : memref<1x128xf32, #tpu.memory_space<vmem>>, vector<1x128xf32>
    %24 = vector.broadcast %23 : vector<1x128xf32> to vector<128x128xf32>
    %25 = arith.addf %22, %24 : vector<128x128xf32>
    %26 = arith.truncf %8 : vector<128x128xf32> to vector<128x128xbf16>
    %c0_22 = arith.constant 0 : index
    %c0_23 = arith.constant 0 : index
    %27 = vector.load %arg11[%c0_22, %c0_23] : memref<128x128xbf16, #tpu.memory_space<vmem>>, vector<128x128xbf16>
    tpu.vector_store %arg11[%c0_22, %c0_23], %26 {strides = array<i32>} : memref<128x128xbf16, #tpu.memory_space<vmem>>, vector<128x128xbf16>,
    %28 = arith.truncf %13 : vector<128x128xf32> to vector<128x128xbf16>
    %c0_24 = arith.constant 0 : index
    %c0_25 = arith.constant 0 : index
    %29 = vector.load %arg12[%c0_24, %c0_25] : memref<128x128xbf16, #tpu.memory_space<vmem>>, vector<128x128xbf16>
    tpu.vector_store %arg12[%c0_24, %c0_25], %28 {strides = array<i32>} : memref<128x128xbf16, #tpu.memory_space<vmem>>, vector<128x128xbf16>,
    %30 = arith.subf %19, %13 : vector<128x128xf32>
    %31 = arith.subf %25, %1 : vector<128x128xf32>
    %32 = arith.mulf %30, %30 : vector<128x128xf32>
    %33 = vector.shape_cast %32 : vector<128x128xf32> to vector<1x128x128xf32>
    %cst_26 = arith.constant dense<0.000000e+00> : vector<1xf32>
    %34 = vector.multi_reduction <add>, %33, %cst_26 [1, 2] : vector<1x128x128xf32> to vector<1xf32>
    %35 = vector.shape_cast %34 : vector<1xf32> to vector<1x1x1xf32>
    %36 = vector.extract %35[0, 0, 0] : f32 from vector<1x1x1xf32>
    %37 = vector.broadcast %36 : f32 to vector<1x1x128xf32>
    %c0_27 = arith.constant 0 : index
    %c0_28 = arith.constant 0 : index
    %c0_29 = arith.constant 0 : index
    %38 = vector.load %arg13[%c0_27, %c0_28, %c0_29] : memref<1x1x128xf32, #tpu.memory_space<vmem>>, vector<1x1x128xf32>
    tpu.vector_store %arg13[%c0_27, %c0_28, %c0_29], %37 {strides = array<i32>} : memref<1x1x128xf32, #tpu.memory_space<vmem>>, vector<1x1x128xf32>,
    %39 = arith.mulf %31, %31 : vector<128x128xf32>
    %40 = vector.shape_cast %39 : vector<128x128xf32> to vector<1x128x128xf32>
    %cst_30 = arith.constant dense<0.000000e+00> : vector<1xf32>
    %41 = vector.multi_reduction <add>, %40, %cst_30 [1, 2] : vector<1x128x128xf32> to vector<1xf32>
    %42 = vector.shape_cast %41 : vector<1xf32> to vector<1x1x1xf32>
    %43 = vector.extract %42[0, 0, 0] : f32 from vector<1x1x1xf32>
    %44 = vector.broadcast %43 : f32 to vector<1x1x128xf32>
    %c0_31 = arith.constant 0 : index
    %c0_32 = arith.constant 0 : index
    %c0_33 = arith.constant 0 : index
    %45 = vector.load %arg14[%c0_31, %c0_32, %c0_33] : memref<1x1x128xf32, #tpu.memory_space<vmem>>, vector<1x1x128xf32>
    tpu.vector_store %arg14[%c0_31, %c0_32, %c0_33], %44 {strides = array<i32>} : memref<1x1x128xf32, #tpu.memory_space<vmem>>, vector<1x1x128xf32>,
    return
  }
  func.func @transform_0(%arg0: i32) -> (i32, i32) {
    %c0_i32 = arith.constant 0 : i32
    %c0_i32_0 = arith.constant 0 : i32
    return %arg0, %c0_i32 : i32, i32
  }
  func.func @transform_1(%arg0: i32) -> (i32, i32) {
    %c0_i32 = arith.constant 0 : i32
    %c0_i32_0 = arith.constant 0 : i32
    return %arg0, %c0_i32 : i32, i32
  }
  func.func @transform_2(%arg0: i32) -> (i32, i32) {
    %c0_i32 = arith.constant 0 : i32
    %c0_i32_0 = arith.constant 0 : i32
    %c0_i32_1 = arith.constant 0 : i32
    return %c0_i32, %c0_i32_0 : i32, i32
  }
  func.func @transform_3(%arg0: i32) -> (i32, i32) {
    %c0_i32 = arith.constant 0 : i32
    %c0_i32_0 = arith.constant 0 : i32
    %c0_i32_1 = arith.constant 0 : i32
    return %c0_i32, %c0_i32_0 : i32, i32
  }
  func.func @transform_4(%arg0: i32) -> (i32, i32) {
    %c0_i32 = arith.constant 0 : i32
    %c0_i32_0 = arith.constant 0 : i32
    %c0_i32_1 = arith.constant 0 : i32
    return %c0_i32, %c0_i32_0 : i32, i32
  }
  func.func @transform_5(%arg0: i32) -> (i32, i32) {
    %c0_i32 = arith.constant 0 : i32
    %c0_i32_0 = arith.constant 0 : i32
    %c0_i32_1 = arith.constant 0 : i32
    return %c0_i32, %c0_i32_0 : i32, i32
  }
  func.func @transform_6(%arg0: i32) -> (i32, i32) {
    %c0_i32 = arith.constant 0 : i32
    %c0_i32_0 = arith.constant 0 : i32
    %c0_i32_1 = arith.constant 0 : i32
    return %c0_i32, %c0_i32_0 : i32, i32
  }
  func.func @transform_7(%arg0: i32) -> (i32, i32) {
    %c0_i32 = arith.constant 0 : i32
    %c0_i32_0 = arith.constant 0 : i32
    %c0_i32_1 = arith.constant 0 : i32
    return %c0_i32, %c0_i32_0 : i32, i32
  }
  func.func @transform_8(%arg0: i32) -> (i32, i32) {
    %c0_i32 = arith.constant 0 : i32
    %c0_i32_0 = arith.constant 0 : i32
    %c0_i32_1 = arith.constant 0 : i32
    return %c0_i32, %c0_i32_0 : i32, i32
  }
  func.func @transform_9(%arg0: i32) -> (i32, i32) {
    %c0_i32 = arith.constant 0 : i32
    %c0_i32_0 = arith.constant 0 : i32
    %c0_i32_1 = arith.constant 0 : i32
    return %c0_i32, %c0_i32_0 : i32, i32
  }
  func.func @transform_10(%arg0: i32) -> (i32, i32) {
    %c0_i32 = arith.constant 0 : i32
    %c0_i32_0 = arith.constant 0 : i32
    return %arg0, %c0_i32 : i32, i32
  }
  func.func @transform_11(%arg0: i32) -> (i32, i32) {
    %c0_i32 = arith.constant 0 : i32
    %c0_i32_0 = arith.constant 0 : i32
    return %arg0, %c0_i32 : i32, i32
  }
  func.func @transform_12(%arg0: i32) -> (i32, i32, i32) {
    %c0_i32 = arith.constant 0 : i32
    %c0_i32_0 = arith.constant 0 : i32
    %c0_i32_1 = arith.constant 0 : i32
    return %arg0, %c0_i32, %c0_i32_0 : i32, i32, i32
  }
  func.func @transform_13(%arg0: i32) -> (i32, i32, i32) {
    %c0_i32 = arith.constant 0 : i32
    %c0_i32_0 = arith.constant 0 : i32
    %c0_i32_1 = arith.constant 0 : i32
    return %arg0, %c0_i32, %c0_i32_0 : i32, i32, i32
  }
}

</mosaic_0001>

<bundles_post_ra>
// kernel: tpu_custom_call.1
= control target key start
LH: loop header
LB: loop body
LE: loop exit
PB: predicated region body
PF: predicated region fallthrough
CT: control target
= control target key end

     0   :  { %s3610_s0 = inlined_call_operand.hbm [shape: f32[512,128], index: 0, kind: input, shape index: {}]   ;;  %s3611_s1 = inlined_call_operand.hbm [shape: f32[512,128], index: 1, kind: input, shape index: {}]   ;;  %s3612_s2 = inlined_call_operand.hbm [shape: bf16[128,128], index: 2, kind: input, shape index: {}]   ;;  %s3613_s3 = inlined_call_operand.vmem [shape: f32[1,128], index: 3, kind: input, shape index: {}]   ;;  %s3614_s4 = inlined_call_operand.hbm [shape: bf16[128,128], index: 4, kind: input, shape index: {}]   ;;  %s3615_s5 = inlined_call_operand.vmem [shape: f32[1,128], index: 5, kind: input, shape index: {}]   ;;  %s3616_s6 = inlined_call_operand.hbm [shape: bf16[128,128], index: 6, kind: input, shape index: {}]   ;;  %s3617_s7 = inlined_call_operand.vmem [shape: f32[1,128], index: 7, kind: input, shape index: {}]   ;;  %s3618_s8 = inlined_call_operand.hbm [shape: bf16[128,128], index: 8, kind: input, shape index: {}]   ;;  %s3619_s9 = inlined_call_operand.vmem [shape: f32[1,128], index: 9, kind: input, shape index: {}]   ;;  %s3620_s10 = inlined_call_operand.hbm [shape: bf16[512,128], index: 10, kind: output, shape index: {0}]   ;;  %s3621_s11 = inlined_call_operand.hbm [shape: bf16[512,128], index: 11, kind: output, shape index: {1}]   ;;  %s3622_s12 = inlined_call_operand.hbm [shape: f32[4,1,128], index: 12, kind: output, shape index: {2}]   ;;  %s3623_s13 = inlined_call_operand.hbm [shape: f32[4,1,128], index: 13, kind: output, shape index: {3}]  }
   0x1   :  { %3635 = sst [smem:[#allocation29_spill]] %s3610_s0 }
   0x2   :  { %3636 = sst [smem:[#allocation30_spill]] %s3612_s2 }
   0x3   :  { %3637 = sst [smem:[#allocation31_spill]] %s3614_s4 }
   0x4   :  { %3638 = sst [smem:[#allocation32_spill]] %s3619_s9 }
   0x5   :  { %3639 = sst [smem:[#allocation33_spill]] %s3620_s10 }
   0x6   :  { %3640 = sst [smem:[#allocation34_spill]] %s3621_s11 }
   0x7   :  { %3641 = sst [smem:[#allocation35_spill]] %s3622_s12 }
   0x8   :  { %3642 = sst [smem:[#allocation36_spill]] %s3623_s13 }
   0x9   :  { %19 = vsyncpa [#allocation3], 0 }
   0xa   :  { %21 = vsyncpa [#allocation3 + $0x1], 0 }
   0xb   :  { %22 = vsyncpa [#allocation6], 0 }
   0xc   :  { %24 = vsyncpa [#allocation6 + $0x1], 0 }
   0xd   :  { %25 = vsyncpa [#allocation9], 0 }
   0xe   :  { %26 = vsyncpa [#allocation12], 0 }
   0xf   :  { %27 = vsyncpa [#allocation4], 0 }
  0x10   :  { %29 = vsyncpa [#allocation4 + $0x1], 0 }
  0x11   :  { %30 = vsyncpa [#allocation15], 0 }
  0x12   :  { %32 = vsyncpa [#allocation15 + $0x1], 0 }
  0x13   :  { %33 = vsyncpa [#allocation18], 0 }
  0x14   :  { %35 = vsyncpa [#allocation18 + $0x1], 0  ;;  %s2877_s25 = smov 0   ;;  %s2879_s26 = smov 0  }
  0x15   :  { %s2881_s27 = smov 0   ;;  %s2883_s28 = smov 0  }
  0x16 LB: > { %3643 = sst [smem:[#allocation27_spill]] %s2777_s25  ;;  %s2898_s29 = sadd.s32 4294967295, %s2789_s28   ;;  %s2789_s28 = sphi %s2883_s28, %s3676_s28   ;;  %s2785_s27 = sphi %s2881_s27, %s3675_s27   ;;  %s2781_s26 = sphi %s2879_s26, %s3674_s26   ;;  %s2777_s25 = sphi %s2877_s25, %s3673_s25  }
  0x17   : > { %s3624_s30 = sadd.s32 4294967294, %s2789_s28   ;;  %p61_p0 = scmp.ne.s32.totalorder %s2781_s26, %s2777_s25 }
  0x18   : > { %p3628_p1 = scmp.eq.s32.totalorder %s2898_s29, 0  ;;  %p285_p3 = scmp.eq.s32.totalorder %s3624_s30, 3 }
  0x19   : > { %p1873_p5 = scmp.ge.s32.totalorder %s2789_s28, 1  ;;  %p370_p7 = scmp.lt.s32.totalorder %s2789_s28, 5 }
  0x1a   : > { %p2909_p4 = por %p3628_p1, %p61_p0  ;;  %p2914_p6 = por %p285_p3, %p61_p0 }
  0x1b   : > { %p2919_p8 = pnand %p1873_p5, %p370_p7  ;;  %s2791_s17 = smov [#allocation7]  }
  0x1c   : > { %s3644_s14 = scalar_select %p2909_p4, 1, 0 }
  0x1d   : > { %s3645_s15 = scalar_select %p2914_p6, 1, 0 }
  0x1e   : > { %s3647_s16 = scalar_select %p2919_p8, 1, 0 }
  0x1f   : > { %3646 = sst [smem:[#allocation28_spill]] %s3645_s15  ;;  %s382_s18 = sshll.u32 %s2791_s17, 4  ;;  %s2923_s18 = int_to_ptr.vmem [resolvable:$true] %s382_s18 }
  0x20   : > { %p2326_p9 = pneg %p2919_p8  ;;  %s2792_s20 = smov [#allocation8]  }
  0x21   : > { %s398_s21 = sshll.u32 %s2792_s20, 4  ;;  %s2793_s22 = smov [#allocation10]   ;;  %s2933_s21 = int_to_ptr.vmem [resolvable:$true] %s398_s21 }
  0x22   : > { %p2929_p10 = pnand %p2326_p9, %p3628_p1  ;;  %s2935_s23 = sshll.u32 %s2793_s22, 4  ;;  %s415_s23 = int_to_ptr.vmem [resolvable:$true] %s2935_s23 }
  0x23   : > { %s3649_s2 = sld [smem:[#allocation30_spill]] }
  0x24   : > { %p2945_p12 = pneg %p2929_p10 }
  0x29   : > { %s2443_s17 = scalar_lea.hbm %s3649_s2, 1024 }
  0x2a   : > { %p2444_p11 = scmp.ne.s32.totalorder %s3649_s2, %s2443_s17  ;;  %p2450_p3 = scmp.lt.u32.totalorder %s2443_s17, %s3649_s2 }
  0x2c   : > { %p2446_p13 = pnand %p2945_p12, %p2444_p11 }
  0x2e   : > { %p2447_p0 = pneg %p2446_p13 }
  0x30   : > { %p2452_p5 = pnand %p2450_p3, %p2447_p0 }
  0x32   : > { %2455 = shalt.err (!%p2452_p5)
}
  0x33   : > { %s2456_s25 = scalar_lea.vmem %s2923_s18, 1024  ;;  %p2464_p2 = scmp.lt.s32.totalorder %s2923_s18, %s2923_s18 }
  0x34   : > { %p2457_p7 = scmp.ne.s32.totalorder %s2923_s18, %s2456_s25  ;;  %p2465_p6 = scmp.lt.s32.totalorder %s2456_s25, %s2456_s25 }
  0x36   : > { %p2459_p9 = pnand %p2457_p7, %p2945_p12  ;;  %p2466_p11 = por %p2465_p6, %p2464_p2 }
  0x38   : > { %p2460_p1 = pneg %p2459_p9 }
  0x3a   : > { %p2467_p13 = pnand %p2466_p11, %p2460_p1 }
  0x3c   : > { %2470 = shalt.err (!%p2467_p13)
}
  0x3d   : > { %s2794_s30 = smov 64   ;;  %s2795_s15 = smov 4  }
  0x3e   : > { %2329 = dma.hbm_to_vmem [thread:$0]  (!%p2929_p10), %s3649_s2, 1024, %s2923_s18, [#allocation6], %s2794_s30, %s2794_s30, %s2795_s15  }
  0x3f   : > { %s3651_s4 = sld [smem:[#allocation31_spill]] }
  0x45   : > { %s2471_s25 = scalar_lea.hbm %s3651_s4, 1024 }
  0x46   : > { %p2472_p1 = scmp.ne.s32.totalorder %s3651_s4, %s2471_s25  ;;  %p2478_p0 = scmp.lt.u32.totalorder %s2471_s25, %s3651_s4 }
  0x48   : > { %p2474_p2 = pnand %p2472_p1, %p2945_p12 }
  0x4a   : > { %p2475_p6 = pneg %p2474_p2 }
  0x4c   : > { %p2480_p3 = pnand %p2478_p0, %p2475_p6 }
  0x4e   : > { %2483 = shalt.err (!%p2480_p3)
}
  0x4f   : > { %s2484_s18 = scalar_lea.vmem %s2933_s21, 1024  ;;  %p2492_p11 = scmp.lt.s32.totalorder %s2933_s21, %s2933_s21 }
  0x50   : > { %p2485_p5 = scmp.ne.s32.totalorder %s2933_s21, %s2484_s18  ;;  %p2493_p13 = scmp.lt.s32.totalorder %s2484_s18, %s2484_s18 }
  0x52   : > { %p2487_p7 = pnand %p2485_p5, %p2945_p12  ;;  %p2494_p1 = por %p2493_p13, %p2492_p11 }
  0x54   : > { %p2488_p9 = pneg %p2487_p7 }
  0x56   : > { %p2495_p2 = pnand %p2494_p1, %p2488_p9 }
  0x58   : > { %2498 = shalt.err (!%p2495_p2)
}
  0x59   : > { %2332 = dma.hbm_to_vmem [thread:$0]  (!%p2929_p10), %s3651_s4, 1024, %s2933_s21, [#allocation9], %s2794_s30, %s2794_s30, %s2795_s15  }
  0x5a   : > { %s2499_s24 = scalar_lea.hbm %s3616_s6, 1024 }
  0x5b   : > { %p2500_p6 = scmp.ne.s32.totalorder %s3616_s6, %s2499_s24  ;;  %p2506_p5 = scmp.lt.u32.totalorder %s2499_s24, %s3616_s6 }
  0x5d   : > { %p2502_p0 = pnand %p2500_p6, %p2945_p12 }
  0x5f   : > { %p2503_p3 = pneg %p2502_p0 }
  0x61   : > { %p2508_p7 = pnand %p2506_p5, %p2503_p3 }
  0x63   : > { %2511 = shalt.err (!%p2508_p7)
}
  0x64   : > { %s2512_s18 = scalar_lea.vmem %s415_s23, 1024  ;;  %p2520_p1 = scmp.lt.s32.totalorder %s415_s23, %s415_s23 }
  0x65   : > { %p2513_p9 = scmp.ne.s32.totalorder %s415_s23, %s2512_s18  ;;  %p2521_p2 = scmp.lt.s32.totalorder %s2512_s18, %s2512_s18 }
  0x67   : > { %p2515_p11 = pnand %p2513_p9, %p2945_p12  ;;  %p2522_p4 = por %p2521_p2, %p2520_p1 }
  0x69   : > { %p2516_p13 = pneg %p2515_p11 }
  0x6b   : > { %p2523_p8 = pnand %p2522_p4, %p2516_p13 }
  0x6d   : > { %2526 = shalt.err (!%p2523_p8)
}
  0x6e   : > { %2335 = dma.hbm_to_vmem [thread:$0]  (!%p2929_p10), %s3616_s6, 1024, %s415_s23, [#allocation9], %s2794_s30, %s2794_s30, %s2795_s15  }
  0x6f   : > { %s2796_s10 = smov [#allocation11]   ;;  %s2527_s17 = scalar_lea.hbm %s3618_s8, 1024 }
  0x70   : > { %s430_s11 = sshll.u32 %s2796_s10, 4  ;;  %p2528_p4 = scmp.ne.s32.totalorder %s3618_s8, %s2527_s17  ;;  %s431_s11 = int_to_ptr.vmem [resolvable:$true] %s430_s11 }
  0x71   : > { %p2534_p0 = scmp.lt.u32.totalorder %s2527_s17, %s3618_s8 }
  0x72   : > { %p2530_p8 = pnand %p2528_p4, %p2945_p12 }
  0x74   : > { %p2531_p6 = pneg %p2530_p8 }
  0x76   : > { %p2536_p3 = pnand %p2534_p0, %p2531_p6 }
  0x78   : > { %2539 = shalt.err (!%p2536_p3)
}
  0x79   : > { %s2540_s23 = scalar_lea.vmem %s431_s11, 1024  ;;  %p2548_p11 = scmp.lt.s32.totalorder %s431_s11, %s431_s11 }
  0x7a   : > { %p2541_p5 = scmp.ne.s32.totalorder %s431_s11, %s2540_s23  ;;  %p2549_p13 = scmp.lt.s32.totalorder %s2540_s23, %s2540_s23 }
  0x7c   : > { %p2543_p7 = pnand %p2541_p5, %p2945_p12  ;;  %p2550_p1 = por %p2549_p13, %p2548_p11 }
  0x7e   : > { %p2544_p9 = pneg %p2543_p7 }
  0x80   : > { %p2551_p2 = pnand %p2550_p1, %p2544_p9 }
  0x82   : > { %2554 = shalt.err (!%p2551_p2)
}
  0x83   : > { %2338 = dma.hbm_to_vmem [thread:$0]  (!%p2929_p10), %s3618_s8, 1024, %s431_s11, [#allocation12], %s2794_s30, %s2794_s30, %s2795_s15  }
  0x84   : > { %s3039_s13 = sadd.s32 1, %s2789_s28   ;;  %s48_s19 = sadd.s32 1, %s2785_s27 }
  0x85   : > { %s45_s10 = ssub.s32 %s2789_s28, %s3039_s13  ;;  %p55_p12 = scmp.ne.s32.totalorder %s2785_s27, %s2781_s26 }
  0x86   : > { %p46_p4 = scmp.eq.s32.totalorder %s45_s10, 0  ;;  %p56_p8 = scmp.eq.s32.totalorder %s2789_s28, 0 }
  0x87   : > { %p3652_p6 = scmp.eq.s32.totalorder %s2898_s29, 3  ;;  %p2363_p3 = scmp.lt.s32.totalorder %s2789_s28, 4 }
  0x88   : > { %s3055_s24 = scalar_select %p46_p4, %s2785_s27, %s48_s19  }
  0x89   : > { %p3049_p0 = por %p3652_p6, %p55_p12  ;;  %p57_p5 = por %p56_p8, %p55_p12 }
  0x8a   : > { %s447_s17 = sand.u32 1, %s2785_s27   ;;  %s1972_s30 = sshll.u32 %s2789_s28, 11 }
  0x8b   : > { %s3058_s20 = sshll.u32 %s447_s17, 7  ;;  %s3654_s0 = sld [smem:[#allocation29_spill]] }
  0x8c   : > { %s451_s25 = scalar_lea.vmem [#allocation2], %s3058_s20  ;;  %p3071_p10 = pnand %p2363_p3, %p57_p5 }
  0x8d   : > { %s458_s18 = sshll.u32 %s451_s25, 4  ;;  %s3075_s21 = scalar_lea.sflag [#allocation3], %s447_s17  ;;  %s3069_s18 = int_to_ptr.vmem [resolvable:$true] %s458_s18 }
  0x8e   : > { %p2557_p9 = pneg %p3071_p10 }
  0x91   : > { %s3066_s22 = scalar_lea.hbm %s3654_s0, %s1972_s30  ;;  %s2560_s15 = scalar_lea.hbm %s3654_s0, 8192 }
  0x92   : > { %s2555_s9 = scalar_lea.hbm %s3066_s22, 2048  ;;  %p2561_p1 = scmp.lt.u32.totalorder %s3066_s22, %s3654_s0 }
  0x93   : > { %p2556_p7 = scmp.ne.s32.totalorder %s3066_s22, %s2555_s9  ;;  %p2562_p2 = scmp.lt.u32.totalorder %s2560_s15, %s2555_s9 }
  0x94   : > { %p2564_p4 = scmp.lt.u32.totalorder %s2555_s9, %s3066_s22 }
  0x95   : > { %p2558_p11 = pnand %p2557_p9, %p2556_p7  ;;  %p2563_p12 = por %p2562_p2, %p2561_p1 }
  0x97   : > { %p2559_p13 = pneg %p2558_p11  ;;  %p2565_p8 = por %p2564_p4, %p2563_p12 }
  0x99   : > { %p2566_p6 = pnand %p2565_p8, %p2559_p13 }
  0x9b   : > { %2569 = shalt.err (!%p2566_p6)
}
  0x9c   : > { %s2570_s17 = scalar_lea.vmem %s3069_s18, 2048  ;;  %s2797_s19 = smov [#allocation2]  }
  0x9d   : > { %p2571_p3 = scmp.ne.s32.totalorder %s3069_s18, %s2570_s17  ;;  %s2575_s10 = sshll.u32 %s2797_s19, 4  ;;  %s2576_s10 = int_to_ptr.vmem [resolvable:$false] %s2575_s10 }
  0x9e   : > { %s2577_s11 = scalar_lea.vmem %s2576_s10, 4096  ;;  %p2578_p11 = scmp.lt.s32.totalorder %s3069_s18, %s2576_s10 }
  0x9f   : > { %p2573_p5 = pnand %p2571_p3, %p2557_p9  ;;  %p2579_p1 = scmp.lt.s32.totalorder %s2577_s11, %s2570_s17 }
  0xa1   : > { %p2574_p7 = pneg %p2573_p5  ;;  %p2580_p2 = por %p2579_p1, %p2578_p11 }
  0xa3   : > { %p2581_p12 = pnand %p2580_p2, %p2574_p7 }
  0xa5   : > { %2584 = shalt.err (!%p2581_p12)
}
  0xa6   : > { %s2798_s9 = smov 128   ;;  %s2799_s15 = smov 8  }
  0xa7   : > { %2342 = dma.hbm_to_vmem [thread:$0]  (!%p3071_p10), %s3066_s22, 2048, %s3069_s18, %s3075_s21, %s2798_s9, %s2798_s9, %s2799_s15  }
  0xa8   : > { %s3111_s19 = scalar_lea.hbm %s3611_s1, %s1972_s30  ;;  %s472_s10 = scalar_lea.vmem [#allocation5], %s3058_s20 }
  0xa9   : > { %s479_s11 = sshll.u32 %s472_s10, 4  ;;  %s468_s0 = sand.u32 1, %s2789_s28   ;;  %s3114_s11 = int_to_ptr.vmem [resolvable:$true] %s479_s11 }
  0xaa   : > { %s3117_s2 = scalar_lea.sflag [#allocation6], %s468_s0  ;;  %s2585_s4 = scalar_lea.hbm %s3111_s19, 2048 }
  0xab   : > { %p2586_p13 = scmp.ne.s32.totalorder %s3111_s19, %s2585_s4  ;;  %s2590_s18 = scalar_lea.hbm %s3611_s1, 8192 }
  0xac   : > { %p2591_p6 = scmp.lt.u32.totalorder %s3111_s19, %s3611_s1  ;;  %p2592_p3 = scmp.lt.u32.totalorder %s2590_s18, %s2585_s4 }
  0xad   : > { %p2588_p4 = pnand %p2586_p13, %p2557_p9  ;;  %p2594_p7 = scmp.lt.u32.totalorder %s2585_s4, %s3111_s19 }
  0xae   : > { %p2593_p5 = por %p2592_p3, %p2591_p6 }
  0xaf   : > { %p2589_p8 = pneg %p2588_p4 }
  0xb0   : > { %p2595_p11 = por %p2594_p7, %p2593_p5 }
  0xb2   : > { %p2596_p1 = pnand %p2595_p11, %p2589_p8 }
  0xb4   : > { %2599 = shalt.err (!%p2596_p1)
}
  0xb5   : > { %s2600_s0 = scalar_lea.vmem %s3114_s11, 2048  ;;  %s2800_s20 = smov [#allocation5]  }
  0xb6   : > { %p2601_p2 = scmp.ne.s32.totalorder %s3114_s11, %s2600_s0  ;;  %s2605_s17 = sshll.u32 %s2800_s20, 4  ;;  %s2606_s17 = int_to_ptr.vmem [resolvable:$false] %s2605_s17 }
  0xb7   : > { %s2607_s10 = scalar_lea.vmem %s2606_s17, 4096  ;;  %p2608_p4 = scmp.lt.s32.totalorder %s3114_s11, %s2606_s17 }
  0xb8   : > { %p2603_p12 = pnand %p2601_p2, %p2557_p9  ;;  %p2609_p6 = scmp.lt.s32.totalorder %s2607_s10, %s2600_s0 }
  0xba   : > { %p2604_p13 = pneg %p2603_p12  ;;  %p2610_p3 = por %p2609_p6, %p2608_p4 }
  0xbc   : > { %p2611_p5 = pnand %p2610_p3, %p2604_p13 }
  0xbe   : > { %2614 = shalt.err (!%p2611_p5)
}
  0xbf   : > { %2345 = dma.hbm_to_vmem [thread:$0]  (!%p3071_p10), %s3111_s19, 2048, %s3114_s11, %s3117_s2, %s2798_s9, %s2798_s9, %s2799_s15  }
  0xc0   : > { %p3656_p9 = scmp.ne.s32.totalorder %s3647_s16, 0 }
  0xc1   : > { %s3149_s4 = sand.u32 (!%p3656_p9), 1, %s2781_s26   ;;  %p3657_p8 = scmp.ne.s32.totalorder (!%p3656_p9), %s3644_s14, 0 }
  0xc2   : > { %491 = sbr.rel (%p3656_p9) target bundleno = 962 (0x3c2), region = 60  ;;  %s1886_s22 = sshll.u32 (!%p3656_p9), %s3149_s4, 7 }
  0xc3   : > { %s494_s30 = scalar_lea.sflag (!%p3656_p9), [#allocation3], %s3149_s4  ;;  %s3153_s18 = scalar_lea.vmem (!%p3656_p9), [#allocation2], %s1886_s22 }
  0xc9   : > { %2744 = dma.done.wait (%p3657_p8), %s494_s30, 2048  }
  0xca   : > { %2746 = vsyncadd (%p3657_p8), %s494_s30, 4294965248  ;;  %s502_s2 = sand.u32 1, %s2898_s29   ;;  %s3162_s23 = scalar_lea.vmem [#allocation5], %s1886_s22 }
  0xcb   : > { %s503_s16 = scalar_lea.sflag [#allocation6], %s502_s2 }
  0xcc   : > { %2748 = dma.done.wait (%p3657_p8), %s503_s16, 2048  }
  0xcd   : > { %2750 = vsyncadd (%p3657_p8), %s503_s16, 4294965248  ;;  %p3658_p10 = scmp.eq.s32.totalorder %s2898_s29, 0 }
  0xcf   : > { %2752 = dma.done.wait (%p3658_p10), [#allocation6], 1024   ;;  %p3659_p7 = pmov %p3658_p10 }
  0xd1   : > { %2754 = vsyncadd (%p3659_p7), [#allocation6], 4294966272  ;;  %p3660_p11 = pmov %p3659_p7 }
  0xd2   : > { %p3661_p1 = pmov %p3659_p7 }
  0xd3   : > { %2756 = dma.done.wait (%p3660_p11), [#allocation9], 2048  }
  0xd4   : > { %2758 = vsyncadd (%p3661_p1), [#allocation9], 4294965248  ;;  %p3662_p2 = pmov %p3661_p1 }
  0xd5   : > { %p3663_p12 = pmov %p3661_p1 }
  0xd6   : > { %2760 = dma.done.wait (%p3662_p2), [#allocation12], 1024  }
  0xd7   : > { %2762 = vsyncadd (%p3663_p12), [#allocation12], 4294966272  ;;  %v2411_v0 = vld [vmem:[#allocation7] sm:$0xff]   ;;  %v2413_v2 = vld [vmem:[#allocation7 + $0x8] sm:$0xff]   ;;  %s1892_s11 = sshll.u32 %s3149_s4, 6  ;;  %s3664_s22 = sld [smem:[#allocation32_spill]] }
  0xd8   : > { %v2412_v1 = vld [vmem:[#allocation8] sm:$0xff]   ;;  %2166 = vmatprep.subr.bf16.mxu0 %v2411_v0  ;;  %v2414_v3 = vld [vmem:[#allocation8 + $0x8] sm:$0xff]   ;;  %v2415_v4 = vld [vmem:[#allocation7 + $0x10] sm:$0xff]   ;;  %s3289_s21 = scalar_lea.vmem [#allocation13], %s1892_s11  ;;  %s3294_s25 = scalar_lea.vmem [#allocation14], %s1892_s11 }
  0xd9   : > { %2198 = vmatprep.subr.bf16.mxu1 %v2412_v1  ;;  %2167 = vmatpush3.bf16.msra.mxu0 %v2411_v0  ;;  %v2416_v5 = vld [vmem:[#allocation8 + $0x10] sm:$0xff]   ;;  %v2417_v6 = vld [vmem:[#allocation7 + $0x18] sm:$0xff]   ;;  %v2419_v8 = vld [vmem:[#allocation7 + $0x20] sm:$0xff]   ;;  %s1627_s30 = sshll.u32 %s3294_s25, 4  ;;  %s2006_s16 = sshll.u32 %s2898_s29, 10  ;;  %s3448_s30 = int_to_ptr.vmem [resolvable:$true] %s1627_s30 }
  0xda   : > { %2199 = vmatpush3.bf16.msra.mxu1 %v2412_v1  ;;  %2168 = vmatprep.subr.bf16.mxu0 %v2413_v2  ;;  %v2418_v7 = vld [vmem:[#allocation8 + $0x18] sm:$0xff]   ;;  %v2420_v9 = vld [vmem:[#allocation8 + $0x20] sm:$0xff]   ;;  %v2421_v10 = vld [vmem:[#allocation7 + $0x28] sm:$0xff]   ;;  %s3665_s9 = sld [smem:[#allocation34_spill]]  ;;  %s3461_s19 = scalar_lea.sflag [#allocation15], %s502_s2 }
  0xdb   : > { %2200 = vmatprep.subr.bf16.mxu1 %v2414_v3  ;;  %v588_v11 = vld [vmem:[%s3153_s18] sm:$0xff]  ;;  %v589_v12 = vld [vmem:[%s3153_s18 + $0x8] sm:$0xff]  ;;  %v2423_v18 = vld [vmem:[#allocation7 + $0x30] sm:$0xff]   ;;  %s2615_s11 = scalar_lea.vmem %s3448_s30, 1024 }
  0xdc   : > { %v3183_v13 = vld [vmem:[%s3162_s23] sm:$0xff]  ;;  %v2422_v14 = vld [vmem:[#allocation8 + $0x28] sm:$0xff]   ;;  %v620_v15 = vpack.c.bf16 %v589_v12, %v588_v11  ;;  %v2424_v19 = vld [vmem:[#allocation8 + $0x30] sm:$0xff]   ;;  %p2616_p13 = scmp.ne.s32.totalorder %s3448_s30, %s2615_s11 }
  0xdd   : > { %2169 = vmatpush3.bf16.msra.mxu0 %v2413_v2  ;;  %v3186_v16 = vld [vmem:[%s3162_s23 + $0x8] sm:$0xff]  ;;  %v2425_v20 = vld [vmem:[#allocation7 + $0x38] sm:$0xff]   ;;  %v590_v22 = vld [vmem:[%s3153_s18 + $0x10] sm:$0xff] }
  0xde   : > { %2201 = vmatpush3.bf16.msra.mxu1 %v2414_v3  ;;  %2170 = vmatprep.subr.bf16.mxu0 %v2415_v4  ;;  %v628_v17 = vpack.c.bf16 %v3186_v16, %v3183_v13  ;;  %v2426_v21 = vld [vmem:[#allocation8 + $0x38] sm:$0xff]   ;;  %v3193_v24 = vld [vmem:[%s3162_s23 + $0x10] sm:$0xff]  ;;  %v592_v26 = vld [vmem:[%s3153_s18 + $0x20] sm:$0xff]  ;;  %p2617_p4 = pnand %p2616_p13, %p3049_p0 }
  0xdf   : > { %2202 = vmatprep.subr.bf16.mxu1 %v2416_v5  ;;  %2182 = vmatprep.mubr.bf16.mxu0 %v620_v15  ;;  %v591_v23 = vld [vmem:[%s3153_s18 + $0x18] sm:$0xff]  ;;  %v593_v27 = vld [vmem:[%s3153_s18 + $0x28] sm:$0xff]  ;;  %v3201_v28 = vld [vmem:[%s3162_s23 + $0x20] sm:$0xff] }
  0xe0   : > { %2214 = vmatprep.mubr.bf16.mxu1 %v628_v17  ;;  %v3196_v25 = vld [vmem:[%s3162_s23 + $0x18] sm:$0xff]  ;;  %v3204_v29 = vld [vmem:[%s3162_s23 + $0x28] sm:$0xff]  ;;  %v2427_v30 = vld [vmem:[#allocation10] sm:$0xff]   ;;  %v621_v32 = vpack.c.bf16 %v591_v23, %v590_v22  ;;  %v622_v34 = vpack.c.bf16 %v593_v27, %v592_v26  ;;  %s3457_s15 = scalar_lea.hbm %s3665_s9, %s2006_s16  ;;  %p2618_p6 = pneg %p2617_p4 }
  0xe1   : > { %2171 = vmatpush3.bf16.msra.mxu0 %v2415_v4  ;;  %v2428_v31 = vld [vmem:[#allocation11] sm:$0xff]   ;;  %v629_v33 = vpack.c.bf16 %v3196_v25, %v3193_v24  ;;  %v630_v35 = vpack.c.bf16 %v3204_v29, %v3201_v28  ;;  %v594_v36 = vld [vmem:[%s3153_s18 + $0x30] sm:$0xff]  ;;  %v595_v37 = vld [vmem:[%s3153_s18 + $0x38] sm:$0xff] }
  0xe2   : > { %2203 = vmatpush3.bf16.msra.mxu1 %v2416_v5  ;;  %2172 = vmatprep.subr.bf16.mxu0 %v2417_v6  ;;  %v2429_v38 = vld [vmem:[#allocation10 + $0x8] sm:$0xff]   ;;  %v3213_v39 = vld [vmem:[%s3162_s23 + $0x30] sm:$0xff]  ;;  %v3216_v40 = vld [vmem:[%s3162_s23 + $0x38] sm:$0xff]  ;;  %v623_v47 = vpack.c.bf16 %v595_v37, %v594_v36 }
  0xe3   : > { %2204 = vmatprep.subr.bf16.mxu1 %v2418_v7  ;;  %v596_v41 = vld [vmem:[%s3153_s18 + $0x40] sm:$0xff]  ;;  %v597_v42 = vld [vmem:[%s3153_s18 + $0x48] sm:$0xff]  ;;  %v2431_v46 = vld [vmem:[#allocation10 + $0x10] sm:$0xff]   ;;  %v631_v49 = vpack.c.bf16 %v3216_v40, %v3213_v39 }
  0xe4   : > { %v2430_v43 = vld [vmem:[#allocation11 + $0x8] sm:$0xff]   ;;  %v3221_v44 = vld [vmem:[%s3162_s23 + $0x40] sm:$0xff]  ;;  %v2432_v48 = vld [vmem:[#allocation11 + $0x10] sm:$0xff]   ;;  %v624_v50 = vpack.c.bf16 %v597_v42, %v596_v41 }
  0xe5   : > { %2173 = vmatpush3.bf16.msra.mxu0 %v2417_v6  ;;  %v3224_v45 = vld [vmem:[%s3162_s23 + $0x48] sm:$0xff]  ;;  %v2433_v52 = vld [vmem:[#allocation10 + $0x18] sm:$0xff]   ;;  %v598_v54 = vld [vmem:[%s3153_s18 + $0x50] sm:$0xff] }
  0xe6   : > { %2205 = vmatpush3.bf16.msra.mxu1 %v2418_v7  ;;  %2174 = vmatprep.subr.bf16.mxu0 %v2419_v8  ;;  %v632_v51 = vpack.c.bf16 %v3224_v45, %v3221_v44  ;;  %v2434_v53 = vld [vmem:[#allocation11 + $0x18] sm:$0xff]   ;;  %v3233_v56 = vld [vmem:[%s3162_s23 + $0x50] sm:$0xff]  ;;  %v600_v58 = vld [vmem:[%s3153_s18 + $0x60] sm:$0xff] }
  0xe7   : > { %2206 = vmatprep.subr.bf16.mxu1 %v2420_v9  ;;  %v599_v55 = vld [vmem:[%s3153_s18 + $0x58] sm:$0xff]  ;;  %v601_v59 = vld [vmem:[%s3153_s18 + $0x68] sm:$0xff]  ;;  %v3241_v60 = vld [vmem:[%s3162_s23 + $0x60] sm:$0xff] }
  0xe8   : > { %v3236_v57 = vld [vmem:[%s3162_s23 + $0x58] sm:$0xff]  ;;  %v3244_v61 = vld [vmem:[%s3162_s23 + $0x68] sm:$0xff]  ;;  %v2435_v62 = vld [vmem:[#allocation10 + $0x20] sm:$0xff]   ;;  %v625_v63 = vpack.c.bf16 %v599_v55, %v598_v54  ;;  %v626_v2 = vpack.c.bf16 %v601_v59, %v600_v58 }
  0xe9   : > { %2175 = vmatpush3.bf16.msra.mxu0 %v2419_v8  ;;  %v2436_v0 = vld [vmem:[#allocation11 + $0x20] sm:$0xff]   ;;  %v633_v1 = vpack.c.bf16 %v3236_v57, %v3233_v56  ;;  %v634_v3 = vpack.c.bf16 %v3244_v61, %v3241_v60  ;;  %v2437_v4 = vld [vmem:[#allocation10 + $0x28] sm:$0xff]   ;;  %v602_v6 = vld [vmem:[%s3153_s18 + $0x70] sm:$0xff] }
  0xea   : > { %2207 = vmatpush3.bf16.msra.mxu1 %v2420_v9  ;;  %2176 = vmatprep.subr.bf16.mxu0 %v2421_v10  ;;  %v2438_v5 = vld [vmem:[#allocation11 + $0x28] sm:$0xff]   ;;  %v603_v7 = vld [vmem:[%s3153_s18 + $0x78] sm:$0xff]  ;;  %v3253_v8 = vld [vmem:[%s3162_s23 + $0x70] sm:$0xff]  ;;  %s1611_s18 = sshll.u32 %s3289_s21, 4  ;;  %s3450_s18 = int_to_ptr.vmem [resolvable:$true] %s1611_s18 }
  0xeb   : > { %2208 = vmatprep.subr.bf16.mxu1 %v2422_v14  ;;  %v3256_v9 = vld [vmem:[%s3162_s23 + $0x78] sm:$0xff]  ;;  %v2439_v12 = vld [vmem:[#allocation10 + $0x30] sm:$0xff]  }
  0xec   : > { %v635_v11 = vpack.c.bf16 %v3256_v9, %v3253_v8  ;;  %v2441_v15 = vld [vmem:[#allocation10 + $0x38] sm:$0xff]  }
  0xed   : > { %2177 = vmatpush3.bf16.msra.mxu0 %v2421_v10  ;;  %v627_v10 = vpack.c.bf16 %v603_v7, %v602_v6  ;;  %v2442_v17 = vld [vmem:[#allocation11 + $0x38] sm:$0xff]  }
  0xee   : > { %2209 = vmatpush3.bf16.msra.mxu1 %v2422_v14  ;;  %2178 = vmatprep.subr.bf16.mxu0 %v2423_v18  ;;  %v2440_v14 = vld [vmem:[#allocation11 + $0x30] sm:$0xff]  }
  0xef   : > { %2210 = vmatprep.subr.bf16.mxu1 %v2424_v19 }
  0xf1   : > { %2179 = vmatpush3.bf16.msra.mxu0 %v2423_v18  ;;  %v3263_v18 = vld [vmem:[%s3615_s5] ss:$0 sm:$0xff] }
  0xf2   : > { %2211 = vmatpush3.bf16.msra.mxu1 %v2424_v19  ;;  %2180 = vmatprep.subr.bf16.mxu0 %v2425_v20 }
  0xf3   : > { %2212 = vmatprep.subr.bf16.mxu1 %v2426_v21 }
  0xf5   : > { %2181 = vmatpush3.bf16.msra.mxu0 %v2425_v20  ;;  %v3268_v20 = vld [vmem:[%s3613_s3] ss:$0 sm:$0xff] }
  0xf6   : > { %2213 = vmatpush3.bf16.msra.mxu1 %v2426_v21  ;;  %2230 = vmatprep.subr.bf16.mxu0 %v2427_v30 }
  0xf7   : > { %2262 = vmatprep.subr.bf16.mxu1 %v2428_v31 }
  0xf8   : > { %2183 = vmatmul.mubr.bf16.vlgmr.msra.gmra.mrb[0].mxu0 %v621_v32 }
  0xf9   : > { %2215 = vmatmul.mubr.bf16.vlgmr.msra.gmra.mrb[0].mxu1 %v629_v33  ;;  %2186 = vmatprep.mubr.bf16.mxu0 %v622_v34 }
  0xfa   : > { %2218 = vmatprep.mubr.bf16.mxu1 %v630_v35  ;;  %2231 = vmatpush3.bf16.msra.mxu0 %v2427_v30 }
  0xfb   : > { %2263 = vmatpush3.bf16.msra.mxu1 %v2428_v31  ;;  %2232 = vmatprep.subr.bf16.mxu0 %v2429_v38 }
  0xfc   : > { %2264 = vmatprep.subr.bf16.mxu1 %v2430_v43 }
  0xfe   : > { %2233 = vmatpush3.bf16.msra.mxu0 %v2429_v38 }
  0xff   : > { %2265 = vmatpush3.bf16.msra.mxu1 %v2430_v43  ;;  %2234 = vmatprep.subr.bf16.mxu0 %v2431_v46 }
 0x100   : > { %2187 = vmatmul.mubr.bf16.gmra.mrb[4].mxu0 %v623_v47  ;;  %2266 = vmatprep.subr.bf16.mxu1 %v2432_v48 }
 0x101   : > { %2219 = vmatmul.mubr.bf16.gmra.mrb[4].mxu1 %v631_v49  ;;  %2190 = vmatprep.mubr.bf16.mxu0 %v624_v50 }
 0x102   : > { %2222 = vmatprep.mubr.bf16.mxu1 %v632_v51  ;;  %2235 = vmatpush3.bf16.msra.mxu0 %v2431_v46 }
 0x103   : > { %2267 = vmatpush3.bf16.msra.mxu1 %v2432_v48  ;;  %2236 = vmatprep.subr.bf16.mxu0 %v2433_v52 }
 0x104   : > { %2268 = vmatprep.subr.bf16.mxu1 %v2434_v53 }
 0x106   : > { %2237 = vmatpush3.bf16.msra.mxu0 %v2433_v52 }
 0x107   : > { %2269 = vmatpush3.bf16.msra.mxu1 %v2434_v53  ;;  %2238 = vmatprep.subr.bf16.mxu0 %v2435_v62 }
 0x108   : > { %2191 = vmatmul.mubr.bf16.gmra.mrb[8].mxu0 %v625_v63  ;;  %2270 = vmatprep.subr.bf16.mxu1 %v2436_v0 }
 0x109   : > { %2223 = vmatmul.mubr.bf16.gmra.mrb[8].mxu1 %v633_v1  ;;  %2194 = vmatprep.mubr.bf16.mxu0 %v626_v2 }
 0x10a   : > { %2226 = vmatprep.mubr.bf16.mxu1 %v634_v3  ;;  %2239 = vmatpush3.bf16.msra.mxu0 %v2435_v62 }
 0x10b   : > { %2271 = vmatpush3.bf16.msra.mxu1 %v2436_v0  ;;  %2240 = vmatprep.subr.bf16.mxu0 %v2437_v4 }
 0x10c   : > { %2272 = vmatprep.subr.bf16.mxu1 %v2438_v5 }
 0x10e   : > { %2241 = vmatpush3.bf16.msra.mxu0 %v2437_v4 }
 0x10f   : > { %2273 = vmatpush3.bf16.msra.mxu1 %v2438_v5  ;;  %2242 = vmatprep.subr.bf16.mxu0 %v2439_v12 }
 0x110   : > { %2195 = vmatmul.mubr.bf16.gmra.mrb[12].mxu0 %v627_v10  ;;  %2274 = vmatprep.subr.bf16.mxu1 %v2440_v14 }
 0x111   : > { %2227 = vmatmul.mubr.bf16.gmra.mrb[12].mxu1 %v635_v11 }
 0x112   : > { %2243 = vmatpush3.bf16.msra.mxu0 %v2439_v12 }
 0x113   : > { %2275 = vmatpush3.bf16.msra.mxu1 %v2440_v14  ;;  %2244 = vmatprep.subr.bf16.mxu0 %v2441_v15 }
 0x114   : > { %2276 = vmatprep.subr.bf16.mxu1 %v2442_v17 }
 0x116   : > { %2245 = vmatpush3.bf16.msra.mxu0 %v2441_v15 }
 0x117   : > { %2277 = vmatpush3.bf16.msra.mxu1 %v2442_v17 }
 0x1cb   : > { %v2184_v19 = vpop.f32.mrb[0].mxu0 }
 0x1cc   : > { %v2216_v21 = vpop.f32.mrb[0].mxu1  ;;  %v741_v22 = vpop.f32.mrb[1].mxu0  ;;  %v750_v30 = vadd.f32 %v2184_v19, %v3268_v20 }
 0x1cd   : > { %v3272_v23 = vadd.f32 %v2216_v21, %v3263_v18  ;;  %v909_v26 = vpop.f32.mrb[1].mxu1  ;;  %v2185_v27 = vpop.f32.mrb[2].mxu0  ;;  %v742_v35 = vadd.f32 %v3268_v20, %v741_v22 }
 0x1ce   : > { %v3276_v31 = vadd.f32 %v3263_v18, %v909_v26  ;;  %v753_v32 = vadd.f32 %v2185_v27, %v3268_v20  ;;  %v2217_v33 = vpop.f32.mrb[2].mxu1  ;;  %v744_v34 = vpop.f32.mrb[3].mxu0 }
 0x1cf   : > { %v3281_v36 = vadd.f32 %v2217_v33, %v3263_v18  ;;  %v745_v37 = vadd.f32 %v3268_v20, %v744_v34  ;;  %v912_v38 = vpop.f32.mrb[3].mxu1 }
 0x1d0   : > { %v973_v41 = vpack.c.bf16 %v753_v32, %v750_v30  ;;  %v3285_v42 = vadd.f32 %v3263_v18, %v912_v38 }
 0x1d1   : > { %v1149_v43 = vpack.c.bf16 %v3281_v36, %v3272_v23  ;;  %v972_v46 = vpack.c.bf16 %v745_v37, %v742_v35 }
 0x1d2   : > { %2088 = vst [vmem:[%s3289_s21 + $0x8] sm:$0xff] %v973_v41   ;;  %v1148_v47 = vpack.c.bf16 %v3285_v42, %v3276_v31 }
 0x1d3   : > { %2095 = vst [vmem:[%s3294_s25 + $0x8] sm:$0xff] %v1149_v43   ;;  %2012 = vst [vmem:[%s3289_s21] sm:$0xff] %v972_v46   ;;  %v2188_v48 = vpop.f32.mrb[4].mxu0  ;;  %2246 = vmatprep.mubr.bf16.mxu0 %v972_v46 }
 0x1d4   : > { %2052 = vst [vmem:[%s3294_s25] sm:$0xff] %v1148_v47   ;;  %v2220_v49 = vpop.f32.mrb[4].mxu1  ;;  %2278 = vmatprep.mubr.bf16.mxu1 %v1148_v47  ;;  %v757_v50 = vpop.f32.mrb[5].mxu0  ;;  %2247 = vmatmul.mubr.bf16.vlgmr.msra.gmra.mrb[16].mxu0 %v973_v41  ;;  %v766_v54 = vadd.f32 %v2188_v48, %v3268_v20 }
 0x1d5   : > { %v3300_v51 = vadd.f32 %v2220_v49, %v3263_v18  ;;  %v925_v52 = vpop.f32.mrb[5].mxu1  ;;  %2279 = vmatmul.mubr.bf16.vlgmr.msra.gmra.mrb[16].mxu1 %v1149_v43  ;;  %v2189_v53 = vpop.f32.mrb[6].mxu0  ;;  %v758_v63 = vadd.f32 %v3268_v20, %v757_v50 }
 0x1d6   : > { %v3304_v55 = vadd.f32 %v3263_v18, %v925_v52  ;;  %v769_v58 = vadd.f32 %v2189_v53, %v3268_v20  ;;  %v2221_v59 = vpop.f32.mrb[6].mxu1  ;;  %v760_v62 = vpop.f32.mrb[7].mxu0 }
 0x1d7   : > { %v3309_v0 = vadd.f32 %v2221_v59, %v3263_v18  ;;  %v761_v1 = vadd.f32 %v3268_v20, %v760_v62  ;;  %v928_v2 = vpop.f32.mrb[7].mxu1 }
 0x1d8   : > { %v975_v3 = vpack.c.bf16 %v769_v58, %v766_v54  ;;  %v3313_v4 = vadd.f32 %v3263_v18, %v928_v2 }
 0x1d9   : > { %v1151_v5 = vpack.c.bf16 %v3309_v0, %v3300_v51  ;;  %v974_v6 = vpack.c.bf16 %v761_v1, %v758_v63 }
 0x1da   : > { %2090 = vst [vmem:[%s3289_s21 + $0x18] sm:$0xff] %v975_v3   ;;  %v1150_v7 = vpack.c.bf16 %v3313_v4, %v3304_v55 }
 0x1db   : > { %2097 = vst [vmem:[%s3294_s25 + $0x18] sm:$0xff] %v1151_v5   ;;  %2089 = vst [vmem:[%s3289_s21 + $0x10] sm:$0xff] %v974_v6   ;;  %v2192_v10 = vpop.f32.mrb[8].mxu0  ;;  %2250 = vmatprep.mubr.bf16.mxu0 %v974_v6 }
 0x1dc   : > { %2096 = vst [vmem:[%s3294_s25 + $0x10] sm:$0xff] %v1150_v7   ;;  %v2224_v11 = vpop.f32.mrb[8].mxu1  ;;  %2282 = vmatprep.mubr.bf16.mxu1 %v1150_v7  ;;  %v773_v12 = vpop.f32.mrb[9].mxu0  ;;  %2251 = vmatmul.mubr.bf16.gmra.mrb[20].mxu0 %v975_v3  ;;  %v782_v19 = vadd.f32 %v2192_v10, %v3268_v20 }
 0x1dd   : > { %v3324_v14 = vadd.f32 %v2224_v11, %v3263_v18  ;;  %v941_v15 = vpop.f32.mrb[9].mxu1  ;;  %2283 = vmatmul.mubr.bf16.gmra.mrb[20].mxu1 %v1151_v5  ;;  %v2193_v17 = vpop.f32.mrb[10].mxu0  ;;  %v774_v30 = vadd.f32 %v3268_v20, %v773_v12  ;;  %v3379_v12 = vld [vmem:[%s3664_s22] ss:$0 sm:$0xff] }
 0x1de   : > { %v3328_v21 = vadd.f32 %v3263_v18, %v941_v15  ;;  %v785_v22 = vadd.f32 %v2193_v17, %v3268_v20  ;;  %v2225_v26 = vpop.f32.mrb[10].mxu1  ;;  %v776_v27 = vpop.f32.mrb[11].mxu0 }
 0x1df   : > { %v3333_v32 = vadd.f32 %v2225_v26, %v3263_v18  ;;  %v777_v33 = vadd.f32 %v3268_v20, %v776_v27  ;;  %v944_v34 = vpop.f32.mrb[11].mxu1 }
 0x1e0   : > { %v977_v35 = vpack.c.bf16 %v785_v22, %v782_v19  ;;  %v3337_v37 = vadd.f32 %v3263_v18, %v944_v34 }
 0x1e1   : > { %v1153_v38 = vpack.c.bf16 %v3333_v32, %v3324_v14  ;;  %v976_v41 = vpack.c.bf16 %v777_v33, %v774_v30 }
 0x1e2   : > { %2092 = vst [vmem:[%s3289_s21 + $0x28] sm:$0xff] %v977_v35   ;;  %v1152_v43 = vpack.c.bf16 %v3337_v37, %v3328_v21 }
 0x1e3   : > { %2099 = vst [vmem:[%s3294_s25 + $0x28] sm:$0xff] %v1153_v38   ;;  %2091 = vst [vmem:[%s3289_s21 + $0x20] sm:$0xff] %v976_v41   ;;  %v2196_v46 = vpop.f32.mrb[12].mxu0  ;;  %2254 = vmatprep.mubr.bf16.mxu0 %v976_v41 }
 0x1e4   : > { %2098 = vst [vmem:[%s3294_s25 + $0x20] sm:$0xff] %v1152_v43   ;;  %v2228_v47 = vpop.f32.mrb[12].mxu1  ;;  %2286 = vmatprep.mubr.bf16.mxu1 %v1152_v43  ;;  %v789_v48 = vpop.f32.mrb[13].mxu0  ;;  %2255 = vmatmul.mubr.bf16.gmra.mrb[24].mxu0 %v977_v35  ;;  %v798_v53 = vadd.f32 %v2196_v46, %v3268_v20 }
 0x1e5   : > { %v3348_v49 = vadd.f32 %v2228_v47, %v3263_v18  ;;  %v957_v50 = vpop.f32.mrb[13].mxu1  ;;  %2287 = vmatmul.mubr.bf16.gmra.mrb[24].mxu1 %v1153_v38  ;;  %v2197_v52 = vpop.f32.mrb[14].mxu0  ;;  %v790_v63 = vadd.f32 %v3268_v20, %v789_v48 }
 0x1e6   : > { %v3352_v54 = vadd.f32 %v3263_v18, %v957_v50  ;;  %v801_v58 = vadd.f32 %v2197_v52, %v3268_v20  ;;  %v2229_v59 = vpop.f32.mrb[14].mxu1  ;;  %v792_v62 = vpop.f32.mrb[15].mxu0 }
 0x1e7   : > { %v3357_v1 = vadd.f32 %v2229_v59, %v3263_v18  ;;  %v793_v2 = vadd.f32 %v3268_v20, %v792_v62  ;;  %v960_v3 = vpop.f32.mrb[15].mxu1 }
 0x1e8   : > { %v979_v5 = vpack.c.bf16 %v801_v58, %v798_v53  ;;  %v3361_v6 = vadd.f32 %v3263_v18, %v960_v3  ;;  %v3374_v18 = vld [vmem:[%s3617_s7] ss:$0 sm:$0xff] }
 0x1e9   : > { %v1155_v7 = vpack.c.bf16 %v3357_v1, %v3348_v49  ;;  %v978_v10 = vpack.c.bf16 %v793_v2, %v790_v63 }
 0x1ea   : > { %2094 = vst [vmem:[%s3289_s21 + $0x38] sm:$0xff] %v979_v5   ;;  %v1154_v11 = vpack.c.bf16 %v3361_v6, %v3352_v54 }
 0x1eb   : > { %2101 = vst [vmem:[%s3294_s25 + $0x38] sm:$0xff] %v1155_v7   ;;  %2093 = vst [vmem:[%s3289_s21 + $0x30] sm:$0xff] %v978_v10   ;;  %2258 = vmatprep.mubr.bf16.mxu0 %v978_v10  ;;  %s2801_s21 = smov [#allocation14]  }
 0x1ec   : > { %2100 = vst [vmem:[%s3294_s25 + $0x30] sm:$0xff] %v1154_v11   ;;  %2290 = vmatprep.mubr.bf16.mxu1 %v1154_v11  ;;  %2259 = vmatmul.mubr.bf16.gmra.mrb[28].mxu0 %v979_v5  ;;  %s2619_s25 = sshll.u32 %s2801_s21, 4  ;;  %s2620_s25 = int_to_ptr.vmem [resolvable:$false] %s2619_s25 }
 0x1ed   : > { %2291 = vmatmul.mubr.bf16.gmra.mrb[28].mxu1 %v1155_v7  ;;  %s2621_s0 = scalar_lea.vmem %s2620_s25, 2048  ;;  %p2622_p3 = scmp.lt.s32.totalorder %s3448_s30, %s2620_s25 }
 0x1ee   : > { %p2623_p5 = scmp.lt.s32.totalorder %s2621_s0, %s2615_s11 }
 0x1f0   : > { %p2624_p9 = por %p2623_p5, %p2622_p3 }
 0x1f2   : > { %p2625_p8 = pnand %p2624_p9, %p2618_p6 }
 0x2a7   : > { %v2248_v20 = vpop.f32.mrb[16].mxu0 }
 0x2a8   : > { %v2280_v15 = vpop.f32.mrb[16].mxu1  ;;  %v1085_v17 = vpop.f32.mrb[17].mxu0  ;;  %v1094_v19 = vadd.f32 %v2248_v20, %v3374_v18 }
 0x2a9   : > { %v1086_v22 = vadd.f32 %v3374_v18, %v1085_v17  ;;  %v1261_v26 = vpop.f32.mrb[17].mxu1  ;;  %v2249_v27 = vpop.f32.mrb[18].mxu0  ;;  %v1270_v30 = vadd.f32 %v2280_v15, %v3379_v12 }
 0x2aa   : > { %v1262_v33 = vadd.f32 %v3379_v12, %v1261_v26  ;;  %v2281_v34 = vpop.f32.mrb[18].mxu1  ;;  %v1088_v35 = vpop.f32.mrb[19].mxu0  ;;  %v1097_v41 = vadd.f32 %v2249_v27, %v3374_v18  ;;  %v1470_v52 = vsub.f32 %v1094_v19, %v3272_v23 }
 0x2ab   : > { %v1468_v38 = vsub.f32 %v1086_v22, %v3276_v31  ;;  %v1089_v43 = vadd.f32 %v3374_v18, %v1088_v35  ;;  %v1264_v46 = vpop.f32.mrb[19].mxu1  ;;  %v1273_v48 = vadd.f32 %v2281_v34, %v3379_v12  ;;  %v1486_v58 = vsub.f32 %v1270_v30, %v3193_v24 }
 0x2ac   : > { %v1484_v47 = vsub.f32 %v1262_v33, %v3183_v13  ;;  %v1265_v50 = vadd.f32 %v3379_v12, %v1264_v46  ;;  %v1471_v62 = vsub.f32 %v1097_v41, %v3281_v36  ;;  %v1502_v11 = vmul.f32 %v1470_v52, %v1470_v52 }
 0x2ad   : > { %v1469_v53 = vsub.f32 %v1089_v43, %v3285_v42  ;;  %v1500_v31 = vmul.f32 %v1468_v38, %v1468_v38  ;;  %v1487_v13 = vsub.f32 %v1273_v48, %v3196_v25  ;;  %v1544_v24 = vmul.f32 %v1486_v58, %v1486_v58 }
 0x2ae   : > { %v1485_v59 = vsub.f32 %v1265_v50, %v3186_v16  ;;  %v1542_v3 = vmul.f32 %v1484_v47, %v1484_v47  ;;  %v1503_v22 = vmul.f32 %v1471_v62, %v1471_v62 }
 0x2af   : > { %v1501_v63 = vmul.f32 %v1469_v53, %v1469_v53  ;;  %v2252_v2 = vpop.f32.mrb[20].mxu0  ;;  %v1545_v33 = vmul.f32 %v1487_v13, %v1487_v13 }
 0x2b0   : > { %v1543_v5 = vmul.f32 %v1485_v59, %v1485_v59  ;;  %v2284_v7 = vpop.f32.mrb[20].mxu1  ;;  %v1101_v10 = vpop.f32.mrb[21].mxu0  ;;  %v1110_v27 = vadd.f32 %v2252_v2, %v3374_v18 }
 0x2b1   : > { %v1516_v20 = vadd.f32 %v1501_v63, %v1500_v31  ;;  %v1102_v23 = vadd.f32 %v3374_v18, %v1101_v10  ;;  %v1277_v42 = vpop.f32.mrb[21].mxu1  ;;  %v2253_v15 = vpop.f32.mrb[22].mxu0  ;;  %v1286_v35 = vadd.f32 %v2284_v7, %v3379_v12 }
 0x2b2   : > { %v1558_v17 = vadd.f32 %v1543_v5, %v1542_v3  ;;  %v1278_v16 = vadd.f32 %v3379_v12, %v1277_v42  ;;  %v2285_v19 = vpop.f32.mrb[22].mxu1  ;;  %v1104_v36 = vpop.f32.mrb[23].mxu0  ;;  %v1113_v46 = vadd.f32 %v2253_v15, %v3374_v18  ;;  %v1474_v53 = vsub.f32 %v1110_v27, %v3300_v51 }
 0x2b3   : > { %v1517_v26 = vadd.f32 %v1516_v20, %v1502_v11  ;;  %v1472_v25 = vsub.f32 %v1102_v23, %v3304_v55  ;;  %v1280_v30 = vpop.f32.mrb[23].mxu1  ;;  %v1289_v47 = vadd.f32 %v2285_v19, %v3379_v12  ;;  %v1105_v52 = vadd.f32 %v3374_v18, %v1104_v36 }
 0x2b4   : > { %v1559_v34 = vadd.f32 %v1558_v17, %v1544_v24  ;;  %v1488_v38 = vsub.f32 %v1278_v16, %v3201_v28  ;;  %v1281_v58 = vadd.f32 %v3379_v12, %v1280_v30  ;;  %v1490_v31 = vsub.f32 %v1286_v35, %v3213_v39 }
 0x2b5   : > { %v1504_v41 = vmul.f32 %v1472_v25, %v1472_v25  ;;  %v1518_v43 = vadd.f32 %v1517_v26, %v1503_v22  ;;  %v1473_v28 = vsub.f32 %v1105_v52, %v3313_v4  ;;  %v1475_v3 = vsub.f32 %v1113_v46, %v3309_v0 }
 0x2b6   : > { %v1546_v48 = vmul.f32 %v1488_v38, %v1488_v38  ;;  %v1560_v50 = vadd.f32 %v1559_v34, %v1545_v33  ;;  %v1491_v13 = vsub.f32 %v1289_v47, %v3216_v40  ;;  %v1489_v5 = vsub.f32 %v1281_v58, %v3204_v29 }
 0x2b7   : > { %v1519_v55 = vadd.f32 %v1518_v43, %v1504_v41  ;;  %v2256_v59 = vpop.f32.mrb[24].mxu0  ;;  %v1505_v11 = vmul.f32 %v1473_v28, %v1473_v28  ;;  %v1506_v4 = vmul.f32 %v1474_v53, %v1474_v53  ;;  %v1548_v17 = vmul.f32 %v1490_v31, %v1490_v31 }
 0x2b8   : > { %v1561_v62 = vadd.f32 %v1560_v50, %v1546_v48  ;;  %v2288_v63 = vpop.f32.mrb[24].mxu1  ;;  %v1117_v2 = vpop.f32.mrb[25].mxu0  ;;  %v1126_v20 = vadd.f32 %v2256_v59, %v3374_v18  ;;  %v1547_v15 = vmul.f32 %v1489_v5, %v1489_v5  ;;  %v1507_v19 = vmul.f32 %v1475_v3, %v1475_v3 }
 0x2b9   : > { %v1118_v7 = vadd.f32 %v3374_v18, %v1117_v2  ;;  %v1293_v51 = vpop.f32.mrb[25].mxu1  ;;  %v2257_v10 = vpop.f32.mrb[26].mxu0  ;;  %v1520_v40 = vadd.f32 %v1519_v55, %v1505_v11  ;;  %v1302_v29 = vadd.f32 %v2288_v63, %v3379_v12  ;;  %v1549_v36 = vmul.f32 %v1491_v13, %v1491_v13 }
 0x2ba   : > { %v1294_v39 = vadd.f32 %v3379_v12, %v1293_v51  ;;  %v2289_v23 = vpop.f32.mrb[26].mxu1  ;;  %v1120_v42 = vpop.f32.mrb[27].mxu0  ;;  %v1562_v22 = vadd.f32 %v1561_v62, %v1547_v15  ;;  %v1129_v26 = vadd.f32 %v2257_v10, %v3374_v18  ;;  %v1478_v25 = vsub.f32 %v1126_v20, %v3324_v14 }
 0x2bb   : > { %v1476_v24 = vsub.f32 %v1118_v7, %v3328_v21  ;;  %v1296_v0 = vpop.f32.mrb[27].mxu1  ;;  %v1521_v27 = vadd.f32 %v1520_v40, %v1506_v4  ;;  %v1121_v33 = vadd.f32 %v3374_v18, %v1120_v42  ;;  %v1305_v35 = vadd.f32 %v2289_v23, %v3379_v12 }
 0x2bc   : > { %v1492_v16 = vsub.f32 %v1294_v39, %v3221_v44  ;;  %v1563_v34 = vadd.f32 %v1562_v22, %v1548_v17  ;;  %v1297_v38 = vadd.f32 %v3379_v12, %v1296_v0  ;;  %v1494_v44 = vsub.f32 %v1302_v29, %v3233_v56 }
 0x2bd   : > { %v1508_v30 = vmul.f32 %v1476_v24, %v1476_v24  ;;  %v1522_v43 = vadd.f32 %v1521_v27, %v1507_v19  ;;  %v1477_v46 = vsub.f32 %v1121_v33, %v3337_v37  ;;  %v1479_v14 = vsub.f32 %v1129_v26, %v3333_v32 }
 0x2be   : > { %v1550_v21 = vmul.f32 %v1492_v16, %v1492_v16  ;;  %v1564_v50 = vadd.f32 %v1563_v34, %v1549_v36  ;;  %v1493_v52 = vsub.f32 %v1297_v38, %v3224_v45  ;;  %v1510_v59 = vmul.f32 %v1478_v25, %v1478_v25 }
 0x2bf   : > { %v2260_v41 = vpop.f32.mrb[28].mxu0  ;;  %v1523_v31 = vadd.f32 %v1522_v43, %v1508_v30  ;;  %v1509_v62 = vmul.f32 %v1477_v46, %v1477_v46  ;;  %v1495_v37 = vsub.f32 %v1305_v35, %v3236_v57  ;;  %v1552_v5 = vmul.f32 %v1494_v44, %v1494_v44 }
 0x2c0   : > { %v2292_v47 = vpop.f32.mrb[28].mxu1  ;;  %v1133_v48 = vpop.f32.mrb[29].mxu0  ;;  %v1565_v2 = vadd.f32 %v1564_v50, %v1550_v21  ;;  %v1551_v3 = vmul.f32 %v1493_v52, %v1493_v52  ;;  %v1142_v7 = vadd.f32 %v2260_v41, %v3374_v18  ;;  %v1511_v10 = vmul.f32 %v1479_v14, %v1479_v14 }
 0x2c1   : > { %v1134_v53 = vadd.f32 %v3374_v18, %v1133_v48  ;;  %v1309_v55 = vpop.f32.mrb[29].mxu1  ;;  %v2261_v58 = vpop.f32.mrb[30].mxu0  ;;  %v1524_v45 = vadd.f32 %v1523_v31, %v1509_v62  ;;  %v1318_v20 = vadd.f32 %v2292_v47, %v3379_v12 }
 0x2c2   : > { %v1310_v28 = vadd.f32 %v3379_v12, %v1309_v55  ;;  %v2293_v56 = vpop.f32.mrb[30].mxu1  ;;  %v1136_v63 = vpop.f32.mrb[31].mxu0  ;;  %v1566_v11 = vadd.f32 %v1565_v2, %v1551_v3  ;;  %v1145_v39 = vadd.f32 %v2261_v58, %v3374_v18  ;;  %v1482_v17 = vsub.f32 %v1142_v7, %v3348_v49 }
 0x2c3   : > { %v1480_v13 = vsub.f32 %v1134_v53, %v3352_v54  ;;  %v1312_v32 = vpop.f32.mrb[31].mxu1  ;;  %v1525_v23 = vadd.f32 %v1524_v45, %v1510_v59  ;;  %v1137_v57 = vadd.f32 %v3374_v18, %v1136_v63  ;;  %v1553_v54 = vmul.f32 %v1495_v37, %v1495_v37 }
 0x2c4   : > { %v1496_v51 = vsub.f32 %v1310_v28, %v3241_v60  ;;  %v1313_v4 = vadd.f32 %v3379_v12, %v1312_v32  ;;  %v1567_v15 = vadd.f32 %v1566_v11, %v1552_v5  ;;  %v1321_v0 = vadd.f32 %v2293_v56, %v3379_v12 }
 0x2c5   : > { %v1512_v42 = vmul.f32 %v1480_v13, %v1480_v13  ;;  %v1526_v60 = vadd.f32 %v1525_v23, %v1511_v10  ;;  %v1481_v40 = vsub.f32 %v1137_v57, %v3361_v6  ;;  %v1498_v16 = vsub.f32 %v1318_v20, %v3253_v8 }
 0x2c6   : > { %v1554_v24 = vmul.f32 %v1496_v51, %v1496_v51  ;;  %v1497_v29 = vsub.f32 %v1313_v4, %v3244_v61  ;;  %v1568_v19 = vadd.f32 %v1567_v15, %v1553_v54  ;;  %v1483_v26 = vsub.f32 %v1145_v39, %v3357_v1 }
 0x2c7   : > { %v1527_v36 = vadd.f32 %v1526_v60, %v1512_v42  ;;  %v1513_v22 = vmul.f32 %v1481_v40, %v1481_v40  ;;  %v1499_v12 = vsub.f32 %v1321_v0, %v3256_v9  ;;  %v1514_v49 = vmul.f32 %v1482_v17, %v1482_v17 }
 0x2c8   : > { %v1555_v18 = vmul.f32 %v1497_v29, %v1497_v29  ;;  %v1569_v27 = vadd.f32 %v1568_v19, %v1554_v24  ;;  %v1556_v6 = vmul.f32 %v1498_v16, %v1498_v16  ;;  %v1515_v30 = vmul.f32 %v1483_v26, %v1483_v26 }
 0x2c9   : > { %v1528_v25 = vadd.f32 %v1527_v36, %v1513_v22  ;;  %v1557_v33 = vmul.f32 %v1499_v12, %v1499_v12 }
 0x2ca   : > { %v1570_v61 = vadd.f32 %v1569_v27, %v1555_v18 }
 0x2cb   : > { %v1529_v8 = vadd.f32 %v1528_v25, %v1514_v49 }
 0x2cc   : > { %v1571_v34 = vadd.f32 %v1570_v61, %v1556_v6 }
 0x2cd   : > { %v1530_v21 = vadd.f32 %v1529_v8, %v1515_v30 }
 0x2ce   : > { %v1572_v35 = vadd.f32 %v1571_v34, %v1557_v33 }
 0x2cf   : > { %1531 = vadd.xlane.f32.xlu0 %v1530_v21 }
 0x2d3   : > { %1573 = vadd.xlane.f32.xlu0 %v1572_v35 }
 0x2d4   : > { %2628 = shalt.err (!%p2625_p8)
}
 0x2d5   : > { %s2629_s2 = scalar_lea.hbm %s3457_s15, 1024  ;;  %s2633_s10 = scalar_lea.hbm %s3665_s9, 4096 }
 0x2d6   : > { %p2630_p10 = scmp.ne.s32.totalorder %s3457_s15, %s2629_s2  ;;  %p2634_p1 = scmp.lt.u32.totalorder %s3457_s15, %s3665_s9 }
 0x2d7   : > { %p2635_p2 = scmp.lt.u32.totalorder %s2633_s10, %s2629_s2  ;;  %p2637_p13 = scmp.lt.u32.totalorder %s2629_s2, %s3457_s15 }
 0x2d8   : > { %p2631_p7 = pnand %p2630_p10, %p3049_p0 }
 0x2d9   : > { %p2636_p12 = por %p2635_p2, %p2634_p1 }
 0x2da   : > { %p2632_p11 = pneg %p2631_p7 }
 0x2db   : > { %p2638_p4 = por %p2637_p13, %p2636_p12 }
 0x2dd   : > { %p2639_p6 = pnand %p2638_p4, %p2632_p11 }
 0x2df   : > { %2642 = shalt.err (!%p2639_p6)
}
 0x2e0   : > { %s2802_s14 = smov 64   ;;  %s2803_s11 = smov 4  }
 0x2e1   : > { %2319 = dma.vmem_to_hbm [thread:$0]  (%p3049_p0), %s3448_s30, 1024, %s3457_s15, %s3461_s19, %s2802_s14, %s2802_s14, %s2803_s11  }
 0x2e2   : > { %s3666_s0 = sld [smem:[#allocation33_spill]]  ;;  %s1585_s20 = scalar_lea.sflag [#allocation4], %s3149_s4 }
 0x2e3   : > { %s2643_s17 = scalar_lea.vmem %s3450_s18, 1024  ;;  %s2804_s10 = smov [#allocation13]  }
 0x2e4   : > { %p2644_p3 = scmp.ne.s32.totalorder %s3450_s18, %s2643_s17  ;;  %s2647_s22 = sshll.u32 %s2804_s10, 4  ;;  %s2648_s22 = int_to_ptr.vmem [resolvable:$false] %s2647_s22 }
 0x2e5   : > { %s2649_s23 = scalar_lea.vmem %s2648_s22, 2048  ;;  %p2650_p8 = scmp.lt.s32.totalorder %s3450_s18, %s2648_s22 }
 0x2e6   : > { %p2645_p5 = pnand %p2644_p3, %p3049_p0  ;;  %p2651_p10 = scmp.lt.s32.totalorder %s2649_s23, %s2643_s17 }
 0x2e8   : > { %s3493_s2 = scalar_lea.hbm %s3666_s0, %s2006_s16  ;;  %p2646_p9 = pneg %p2645_p5 }
 0x2e9   : > { %p2652_p7 = por %p2651_p10, %p2650_p8 }
 0x2eb   : > { %p2653_p11 = pnand %p2652_p7, %p2646_p9 }
 0x2ed   : > { %2656 = shalt.err (!%p2653_p11)
}
 0x2ee   : > { %s2657_s30 = scalar_lea.hbm %s3493_s2, 1024  ;;  %s2661_s21 = scalar_lea.hbm %s3666_s0, 4096 }
 0x2ef   : > { %p2658_p1 = scmp.ne.s32.totalorder %s3493_s2, %s2657_s30  ;;  %p2662_p13 = scmp.lt.u32.totalorder %s3493_s2, %s3666_s0 }
 0x2f0   : > { %p2663_p4 = scmp.lt.u32.totalorder %s2661_s21, %s2657_s30  ;;  %p2665_p3 = scmp.lt.u32.totalorder %s2657_s30, %s3493_s2 }
 0x2f1   : > { %p2659_p2 = pnand %p2658_p1, %p3049_p0 }
 0x2f2   : > { %p2664_p6 = por %p2663_p4, %p2662_p13 }
 0x2f3   : > { %p2660_p12 = pneg %p2659_p2 }
 0x2f4   : > { %p2666_p5 = por %p2665_p3, %p2664_p6 }
 0x2f6   : > { %p2667_p9 = pnand %p2666_p5, %p2660_p12 }
 0x2f8   : > { %2670 = shalt.err (!%p2667_p9)
}
 0x2f9   : > { %2318 = dma.vmem_to_hbm [thread:$0]  (%p3049_p0), %s3450_s18, 1024, %s3493_s2, %s1585_s20, %s2802_s14, %s2802_s14, %s2803_s11  }
 0x2fa   : > { %s576_s18 = scalar_lea.vmem [#allocation16], %s3149_s4  ;;  %s1968_s11 = sshll.u32 %s2898_s29, 4 }
 0x2fb   : > { %s1643_s14 = sshll.u32 %s576_s18, 4  ;;  %s582_s2 = scalar_lea.vmem [#allocation17], %s3149_s4  ;;  %s3524_s14 = int_to_ptr.vmem [resolvable:$true] %s1643_s14 }
 0x2fc   : > { %s1656_s20 = sshll.u32 %s582_s2, 4  ;;  %s3667_s30 = sld [smem:[#allocation35_spill]]  ;;  %s3536_s20 = int_to_ptr.vmem [resolvable:$true] %s1656_s20 }
 0x2fd   : > { %s2671_s15 = scalar_lea.vmem %s3524_s14, 16  ;;  %s2805_s21 = smov [#allocation16]  }
 0x2fe   : > { %p2672_p8 = scmp.ne.s32.totalorder %s3524_s14, %s2671_s15  ;;  %s2675_s25 = sshll.u32 %s2805_s21, 4  ;;  %s2676_s25 = int_to_ptr.vmem [resolvable:$false] %s2675_s25 }
 0x2ff   : > { %s2677_s10 = scalar_lea.vmem %s2676_s25, 32  ;;  %p2678_p11 = scmp.lt.s32.totalorder %s3524_s14, %s2676_s25 }
 0x300   : > { %p2673_p10 = pnand %p2672_p8, %p3049_p0  ;;  %p2679_p1 = scmp.lt.s32.totalorder %s2677_s10, %s2671_s15 }
 0x302   : > { %s3534_s16 = scalar_lea.hbm %s3667_s30, %s1968_s11  ;;  %p2674_p7 = pneg %p2673_p10 }
 0x303   : > { %p2680_p2 = por %p2679_p1, %p2678_p11 }
 0x305   : > { %p2681_p12 = pnand %p2680_p2, %p2674_p7 }
 0x35c   : > { %v1532_v9 = vpop.xlane.xlu0 %1531 }
 0x35d   : > { %v1533_v1 = vrot.slane %v1532_v9, 4 }
 0x35f   : > { %v1534_v38 = vadd.f32 %v1533_v1, %v1532_v9 }
 0x360   : > { %v1574_v41 = vpop.xlane.xlu0 %1573 }
 0x361   : > { %v1535_v44 = vrot.slane %v1534_v38, 2  ;;  %v1575_v43 = vrot.slane %v1574_v41, 4 }
 0x363   : > { %v1576_v46 = vadd.f32 %v1575_v43, %v1574_v41  ;;  %v1536_v47 = vadd.f32 %v1535_v44, %v1534_v38 }
 0x365   : > { %v1577_v48 = vrot.slane %v1576_v46, 2  ;;  %v1537_v50 = vrot.slane %v1536_v47, 1 }
 0x367   : > { %v1578_v14 = vadd.f32 %v1577_v48, %v1576_v46  ;;  %v1538_v52 = vadd.f32 %v1537_v50, %v1536_v47 }
 0x369   : > { %2294 = vpush %v1538_v52  ;;  %v1579_v53 = vrot.slane %v1578_v14, 1 }
 0x36b   : > { %v1580_v55 = vadd.f32 %v1579_v53, %v1578_v14 }
 0x36d   : > { %2296 = vpush %v1580_v55 }
 0x39a   : > { %s2295_s17 = spop %2294 }
 0x39b   : > { %v1540_v58 = vstv %s2295_s17 }
 0x39c   : > { %1541 = vst [vmem:[%s576_s18] sm:$0x1] %v1540_v58 }
 0x39d   : > { %2684 = shalt.err (!%p2681_p12)
}
 0x39e   : > { %s2685_s18 = scalar_lea.hbm %s3534_s16, 16  ;;  %s2689_s23 = scalar_lea.hbm %s3667_s30, 64 }
 0x39f   : > { %p2686_p13 = scmp.ne.s32.totalorder %s3534_s16, %s2685_s18  ;;  %p2690_p3 = scmp.lt.u32.totalorder %s3534_s16, %s3667_s30 }
 0x3a0   : > { %p2691_p5 = scmp.lt.u32.totalorder %s2689_s23, %s2685_s18  ;;  %p2693_p8 = scmp.lt.u32.totalorder %s2685_s18, %s3534_s16 }
 0x3a1   : > { %p2687_p4 = pnand %p2686_p13, %p3049_p0 }
 0x3a2   : > { %p2692_p9 = por %p2691_p5, %p2690_p3 }
 0x3a3   : > { %p2688_p6 = pneg %p2687_p4 }
 0x3a4   : > { %p2694_p10 = por %p2693_p8, %p2692_p9 }
 0x3a6   : > { %p2695_p7 = pnand %p2694_p10, %p2688_p6 }
 0x3a8   : > { %2698 = shalt.err (!%p2695_p7)
}
 0x3a9   : > { %2320 = dma.vmem_to_hbm [thread:$0]  (%p3049_p0), %s3524_s14, 16, %s3534_s16, %s3461_s19  }
 0x3aa   : > { %s2297_s15 = spop %2296  ;;  %s3668_s17 = sld [smem:[#allocation36_spill]] }
 0x3ab   : > { %v1582_v59 = vstv %s2297_s15  ;;  %s1599_s23 = scalar_lea.sflag [#allocation18], %s3149_s4  ;;  %s2699_s21 = scalar_lea.vmem %s3536_s20, 16 }
 0x3ac   : > { %1583 = vst [vmem:[%s582_s2] sm:$0x1] %v1582_v59  ;;  %p2700_p11 = scmp.ne.s32.totalorder %s3536_s20, %s2699_s21  ;;  %s2806_s25 = smov [#allocation17]  }
 0x3ad   : > { %s2703_s0 = sshll.u32 %s2806_s25, 4  ;;  %s2704_s0 = int_to_ptr.vmem [resolvable:$false] %s2703_s0 }
 0x3ae   : > { %p2701_p1 = pnand %p2700_p11, %p3049_p0  ;;  %s2705_s19 = scalar_lea.vmem %s2704_s0, 32 }
 0x3af   : > { %p2706_p12 = scmp.lt.s32.totalorder %s3536_s20, %s2704_s0  ;;  %p2707_p13 = scmp.lt.s32.totalorder %s2705_s19, %s2699_s21 }
 0x3b0   : > { %s3565_s22 = scalar_lea.hbm %s3668_s17, %s1968_s11  ;;  %p2702_p2 = pneg %p2701_p1 }
 0x3b1   : > { %p2708_p4 = por %p2707_p13, %p2706_p12 }
 0x3b3   : > { %p2709_p6 = pnand %p2708_p4, %p2702_p2 }
 0x3b5   : > { %2712 = shalt.err (!%p2709_p6)
}
 0x3b6   : > { %s2713_s29 = scalar_lea.hbm %s3565_s22, 16  ;;  %s2717_s11 = scalar_lea.hbm %s3668_s17, 64 }
 0x3b7   : > { %p2714_p3 = scmp.ne.s32.totalorder %s3565_s22, %s2713_s29  ;;  %p2718_p8 = scmp.lt.u32.totalorder %s3565_s22, %s3668_s17 }
 0x3b8   : > { %p2719_p10 = scmp.lt.u32.totalorder %s2717_s11, %s2713_s29  ;;  %p2721_p11 = scmp.lt.u32.totalorder %s2713_s29, %s3565_s22 }
 0x3b9   : > { %p2715_p5 = pnand %p2714_p3, %p3049_p0 }
 0x3ba   : > { %p2720_p7 = por %p2719_p10, %p2718_p8 }
 0x3bb   : > { %p2716_p9 = pneg %p2715_p5 }
 0x3bc   : > { %p2722_p1 = por %p2721_p11, %p2720_p7 }
 0x3be   : > { %p2723_p2 = pnand %p2722_p1, %p2716_p9 }
 0x3c0   : > { %2726 = shalt.err (!%p2723_p2)
}
 0x3c1   : > { %2321 = dma.vmem_to_hbm [thread:$0]  (%p3049_p0), %s3536_s20, 16, %s3565_s22, %s1599_s23  }
 0x3c2 PF: > { %s3669_s16 = sld [smem:[#allocation27_spill]]  ;;  %s3670_s15 = sld [smem:[#allocation28_spill]] }
 0x3c3   : > { %p2368_p12 = scmp.ge.s32.totalorder %s2789_s28, 2 }
 0x3c8   : > { %s1668_s10 = sand.u32 1, %s3669_s16   ;;  %p3671_p13 = scmp.ne.s32.totalorder %s3670_s15, 0 }
 0x3c9   : > { %s1669_s18 = scalar_lea.sflag [#allocation4], %s1668_s10 }
 0x3ca   : > { %p2347_p4 = pnand %p2368_p12, %p3671_p13 }
 0x3cc   : > { %2764 = dma.done.wait (!%p2347_p4), %s1669_s18, 1024  }
 0x3cd   : > { %2766 = vsyncadd (!%p2347_p4), %s1669_s18, 4294966272  ;;  %s3672_s21 = sadd.s32 4294967294, %s2789_s28  }
 0x3ce   : > { %s1677_s25 = sand.u32 1, %s3672_s21  }
 0x3cf   : > { %s1678_s19 = scalar_lea.sflag [#allocation15], %s1677_s25 }
 0x3d0   : > { %2768 = dma.done.wait (!%p2347_p4), %s1678_s19, 1040  }
 0x3d1   : > { %2770 = vsyncadd (!%p2347_p4), %s1678_s19, 4294966256  ;;  %s1695_s12 = scalar_lea.sflag [#allocation18], %s1668_s10 }
 0x3d2   : > { %2772 = dma.done.wait (!%p2347_p4), %s1695_s12, 16  }
 0x3d3   : > { %2774 = vsyncadd (!%p2347_p4), %s1695_s12, 4294967280  ;;  %p38_p0 = scmp.ge.s32.totalorder %s3039_s13, 6   ;;  %s3673_s25 = smov %s2781_s26 }
 0x3d4   : > { %s3674_s26 = smov %s2785_s27  ;;  %s3675_s27 = smov %s3055_s24 }
 0x3d5   : > { %s3676_s28 = smov %s3039_s13  ;;  %40 = sbr.rel (!%p38_p0) target bundleno = 22 (0x16), region = 183 }
 0x3dc   :  { %1699 = vsyncpa [#allocation3], 1 }
 0x3dd   :  { %1701 = vsyncpa [#allocation3 + $0x1], 1 }
 0x3de   :  { %1702 = vsyncpa [#allocation6], 1 }
 0x3df   :  { %1704 = vsyncpa [#allocation6 + $0x1], 1 }
 0x3e0   :  { %1705 = vsyncpa [#allocation9], 1 }
 0x3e1   :  { %1706 = vsyncpa [#allocation12], 1 }
 0x3e2   :  { %1707 = vsyncpa [#allocation4], 1 }
 0x3e3   :  { %1709 = vsyncpa [#allocation4 + $0x1], 1 }
 0x3e4   :  { %1710 = vsyncpa [#allocation15], 1 }
 0x3e5   :  { %1712 = vsyncpa [#allocation15 + $0x1], 1 }
 0x3e6   :  { %1713 = vsyncpa [#allocation18], 1 }
 0x3e7   :  { %1715 = vsyncpa [#allocation18 + $0x1], 1 }

</bundles_post_ra>
